<compile_context>
chip_gen: v7x
topology: tpu7x:2x2x1
jax: 0.10.0
libtpu: 0.0.40
codegen_flags: <defaults>
</compile_context>

<pallas_src>
import functools
import numpy as np
import jax
import jax.numpy as jnp
from jax.experimental import pallas as pl
from jax.experimental.pallas import tpu as pltpu


def _crf_kernel(PAD, START, END,
                P_ref, y_ref, mask_ref, A_ref, AT_ref, expA_ref,
                nll_ref, pred_ref,
                bp_ref):
    P = P_ref[...]            # (TB, L, T) f32
    y = y_ref[...]            # (TB, L) i32
    mask = mask_ref[...]      # (TB, L) i32
    A = A_ref[...]            # (TB? no) (T, T) f32
    A_T = AT_ref[...]         # (T, T) f32, A_T[j, k] = A[k, j]
    expA = expA_ref[...]      # (T, T) f32, exp(A)
    TB, L, T = P.shape

    # ---- hoisted constants (once; JAX does not CSE broadcast_in_dim) -------
    tag_iota = jax.lax.broadcasted_iota(jnp.int32, (TB, T), 1)      # (TB, T)
    pos_iota = jax.lax.broadcasted_iota(jnp.int32, (TB, L), 1)      # (TB, L)
    tag_iota3 = jax.lax.broadcasted_iota(jnp.int32, (TB, L, T), 2)  # (TB, L, T)
    kvec = jax.lax.broadcasted_iota(jnp.int32, (1, 1, T), 2)        # (1, 1, T)
    A_T3 = A_T[None, :, :]                                          # (1, T, T)

    a_start = A[START:START + 1, :]                                 # (1, T) = A[START, :]
    a_end = A_T[END:END + 1, :]                                     # (1, T) = A[:, END]

    maskf = mask.astype(jnp.float32)

    # ---------------- gold score (fully vectorized, no serial dep) ----------
    oh = (tag_iota3 == y[:, :, None]).astype(jnp.float32)           # (TB, L, T)
    emis = jnp.sum(oh * P, axis=2)                                  # (TB, L) emission of gold tag
    start_trans = jnp.sum(oh[:, 0, :] * a_start, axis=1, keepdims=True)   # (TB, 1)
    true_score = emis[:, 0:1] + start_trans                               # (TB, 1)
    if L > 1:
        # rowA[b, i, :] = A[y[b, i], :]  via one batched one-hot matmul on the MXU
        A_b = jnp.broadcast_to(A[None, :, :], (TB, T, T))
        rowA = jnp.einsum('blk,bkj->blj', oh, A_b,
                          preferred_element_type=jnp.float32)       # (TB, L, T)
        trans = jnp.sum(oh[:, 1:, :] * rowA[:, :L - 1, :], axis=2)  # (TB, L-1) A[y_{i-1}, y_i]
        true_score = true_score + jnp.sum(
            maskf[:, 1:] * (emis[:, 1:] + trans), axis=1, keepdims=True)
    # end transition A[last_tag, END]
    last_idx = jnp.sum(mask, axis=1, keepdims=True) - 1             # (TB, 1)
    last_tag = jnp.sum(jnp.where(pos_iota == last_idx, y, 0),
                       axis=1, keepdims=True)                       # (TB, 1)
    oh_last = (tag_iota == last_tag).astype(jnp.float32)
    true_score = true_score + jnp.sum(oh_last * a_end, axis=1, keepdims=True)

    # ---------------- DP over the sequence ----------------------------------
    P0 = P[:, 0, :]
    init = a_start + P0                                             # (TB, T)
    total = init                                                    # forward (log-space) carry
    prob = init                                                     # Viterbi carry

    for i in range(1, L):                                           # unrolled: L is tiny
        Pi = P[:, i, :]                                             # (TB, T)
        nm = mask[:, i:i + 1] > 0                                   # (TB, 1) bool

        # partition function: logsumexp over previous tag via MXU matmul with exp(A)
        mx = jnp.max(total, axis=1, keepdims=True)                  # (TB, 1)
        et = jnp.exp(total - mx)                                    # (TB, T)
        s = jnp.dot(et, expA, preferred_element_type=jnp.float32)   # (TB, T)
        total = jnp.where(nm, Pi + mx + jnp.log(s), total)

        # Viterbi: max-plus over previous tag k (minor axis of the slab);
        # Pi added after the max (argmax over k unaffected).
        m_w = prob[:, None, :] + A_T3                               # (TB, j, k)
        best = jnp.max(m_w, axis=2)                                 # (TB, T)
        bp = jnp.min(jnp.where(m_w == best[:, :, None], kvec, T),
                     axis=2).astype(jnp.int32)                      # first-max index
        bp_ref[i - 1] = bp
        prob = jnp.where(nm, best + Pi, prob)

    # ---------------- log partition + per-example NLL -----------------------
    total = total + a_end
    mxz = jnp.max(total, axis=1, keepdims=True)
    logZ = mxz + jnp.log(jnp.sum(jnp.exp(total - mxz), axis=1, keepdims=True))
    nll_ref[...] = -(true_score - logZ)                             # (TB, 1)

    # ---------------- Viterbi termination + backtrack ------------------------
    prob = prob + a_end
    pmax = jnp.max(prob, axis=1, keepdims=True)
    c = jnp.min(jnp.where(prob == pmax, tag_iota, T),
                axis=1, keepdims=True).astype(jnp.int32)            # (TB, 1) best last tag

    # Accumulate decoded tags in registers; ONE lane-dense store at the end.
    pred = jnp.zeros((TB, L), jnp.float32)
    for i in range(L - 1, 0, -1):
        col = jnp.where(mask[:, i:i + 1] > 0, c, jnp.int32(PAD)).astype(jnp.float32)
        pred = jnp.where(pos_iota == i, col, pred)
        bp = bp_ref[i - 1]                                          # (TB, T)
        c = jnp.sum(jnp.where(tag_iota == c, bp, 0), axis=1, keepdims=True)
    pred = jnp.where(pos_iota == 0, c.astype(jnp.float32), pred)
    pred_ref[...] = pred


class PallasCRF:
    def __init__(self, tag_dict, key):
        self.PAD = tag_dict['<pad>']
        self.START = tag_dict['<start>']
        self.END = tag_dict['<end>']
        T = len(tag_dict)
        # Deterministic "trained-like" parameter with the same structural
        # constraints as the PyTorch __init__.
        A = 0.1 * jax.random.normal(key, (T, T), jnp.float32)
        A = A.at[:, self.START].set(-10000.0)
        A = A.at[self.END, :].set(-10000.0)
        A = A.at[:, self.PAD].set(-10000.0)
        A = A.at[self.PAD, :].set(-10000.0)
        A = A.at[self.PAD, self.PAD].set(0.0)
        A = A.at[self.PAD, self.END].set(0.0)
        self.A = A

    def __call__(self, P, y, mask):
        B, L, T = P.shape
        A = self.A
        A_T = A.T                      # hoisted once (outside the kernel)
        expA = jnp.exp(A)              # hoisted once (outside the kernel)

        kernel = functools.partial(_crf_kernel, self.PAD, self.START, self.END)

        # TODO(synk): for large B pick TB as a multiple of 8 sized to VMEM
        #             (roughly half the v6e tile for v7x's 64 MiB VMEM) and raise
        #             vmem_limit_bytes via pltpu.CompilerParams accordingly.
        TB = B
        nb = pl.cdiv(B, TB)

        nll, pred = pl.pallas_call(
            kernel,
            grid=(nb,),
            out_shape=(jax.ShapeDtypeStruct((B, 1), jnp.float32),
                       jax.ShapeDtypeStruct((B, L), jnp.float32)),
            in_specs=[
                pl.BlockSpec((TB, L, T), lambda b: (b, 0, 0)),   # P
                pl.BlockSpec((TB, L), lambda b: (b, 0)),         # y
                pl.BlockSpec((TB, L), lambda b: (b, 0)),         # mask
                pl.BlockSpec((T, T), lambda b: (0, 0)),          # A (resident)
                pl.BlockSpec((T, T), lambda b: (0, 0)),          # A^T (resident)
                pl.BlockSpec((T, T), lambda b: (0, 0)),          # exp(A) (resident)
            ],
            out_specs=(
                pl.BlockSpec((TB, 1), lambda b: (b, 0)),         # per-example NLL
                pl.BlockSpec((TB, L), lambda b: (b, 0)),         # pred
            ),
            scratch_shapes=[pltpu.VMEM((max(L - 1, 1), TB, T), jnp.int32)],
            compiler_params=pltpu.CompilerParams(
                dimension_semantics=("parallel",)),
        )(P.astype(jnp.float32), y.astype(jnp.int32), mask.astype(jnp.int32),
          A, A_T, expA)

        # Per-block partial losses are reduced here (avoids a cross-block
        # accumulator inside the parallel grid).
        return jnp.sum(nll), pred


def crf_reference(A, P, y, mask, PAD, START, END):
    """Pure numpy re-implementation mirroring the PyTorch code (f32 math)."""
    A = np.asarray(A, np.float32)
    P = np.asarray(P, np.float32)
    y = np.asarray(y, np.int64)
    maski = np.asarray(mask, np.int64)
    maskf = maski.astype(np.float32)
    B, L, T = P.shape
    bi = np.arange(B)

    ts = np.zeros(B, np.float32)
    for i in range(L):
        if i == 0:
            ts += A[START, y[:, 0]] + P[bi, 0, y[:, 0]]
        else:
            ts += (A[y[:, i - 1], y[:, i]] + P[bi, i, y[:, i]]) * maskf[:, i]
    last_idx = maski.sum(1) - 1
    ts += A[y[bi, last_idx], END]

    total = A[START][None, :] + P[:, 0]
    for i in range(1, L):
        m = total[:, :, None] + A[None, :, :] + P[:, i][:, None, :]
        mx = m.max(1)
        lse = (mx + np.log(np.exp(m - mx[:, None, :]).sum(1))).astype(np.float32)
        nm = maskf[:, i][:, None]
        total = lse * nm + total * (1.0 - nm)
    total = total + A[:, END][None, :]
    mx = total.max(1)
    logZ = mx + np.log(np.exp(total - mx[:, None]).sum(1))
    loss = -np.sum(ts - logZ)

    prob = A[START][None, :] + P[:, 0]
    tag = np.tile(np.arange(T)[None, :, None], (B, 1, 1)).astype(np.float32)
    for i in range(1, L):
        temp = prob[:, :, None] + A[None, :, :] + P[:, i][:, None, :]
        new_prob = temp.max(1)
        new_tag = temp.argmax(1)
        nm = maskf[:, i][:, None]
        prob = new_prob * nm + prob * (1.0 - nm)
        append = np.where(nm > 0, np.arange(T, dtype=np.float32)[None, :],
                          np.float32(PAD))[:, :, None]
        pre = tag[bi[:, None], new_tag, :]
        tag = np.concatenate([pre, append], axis=-1)
    prob = prob + A[:, END][None, :]
    best = prob.argmax(-1)
    pred = tag[bi, best]
    return np.float32(loss), pred.astype(np.float32)


if __name__ == "__main__":
    tag_dict = {'<pad>': 0, '<start>': 1, '<end>': 2, 'B': 3, 'I': 4, 'O': 5}
    B, L, T = 2, 8, len(tag_dict)

    key = jax.random.PRNGKey(0)
    kP, kY, kA = jax.random.split(key, 3)

    P = jax.random.normal(kP, (B, L, T), jnp.float32)
    lengths = jnp.array([L, 5], jnp.int32)
    mask = (jax.lax.broadcasted_iota(jnp.int32, (B, L), 1)
            < lengths[:, None]).astype(jnp.int32)
    y = jax.random.randint(kY, (B, L), 3, T).astype(jnp.int32)   # real tags only
    y = jnp.where(mask > 0, y, tag_dict['<pad>'])

    crf = PallasCRF(tag_dict, kA)
    loss, pred = crf(P, y, mask)
    jax.block_until_ready((loss, pred))

    ref_loss, ref_pred = crf_reference(crf.A, P, y, mask,
                                       crf.PAD, crf.START, crf.END)
    assert np.allclose(np.asarray(loss), ref_loss, rtol=1e-4, atol=1e-2), \
        (float(loss), float(ref_loss))
    assert np.array_equal(np.asarray(pred).astype(np.int32),
                          ref_pred.astype(np.int32)), (pred, ref_pred)

    print("KERNEL_OK")
</pallas_src>

<mosaic_0001>
module attributes {stable_mosaic.version = 11 : i64} {
  func.func @_crf_kernel(%arg0: i32, %arg1: memref<2x8x6xf32, #tpu.memory_space<vmem>>, %arg2: memref<2x8xi32, #tpu.memory_space<vmem>>, %arg3: memref<2x8xi32, #tpu.memory_space<vmem>>, %arg4: memref<6x6xf32, #tpu.memory_space<vmem>>, %arg5: memref<6x6xf32, #tpu.memory_space<vmem>>, %arg6: memref<6x6xf32, #tpu.memory_space<vmem>>, %arg7: memref<2x1xf32, #tpu.memory_space<vmem>>, %arg8: memref<2x8xf32, #tpu.memory_space<vmem>>, %arg9: memref<7x2x6xi32, #tpu.memory_space<vmem>>) attributes {dimension_semantics = [#tpu.dimension_semantics<parallel>], iteration_bounds = array<i64: 1>, scalar_prefetch = 0 : i64, scratch_operands = 1 : i64, tpu.core_type = #tpu.core_type<tc>, window_params = [{transform_indices = @transform_0, window_bounds = array<i64: 2, 8, 6>}, {transform_indices = @transform_1, window_bounds = array<i64: 2, 8>}, {transform_indices = @transform_2, window_bounds = array<i64: 2, 8>}, {pipeline_mode = #tpu.pipeline_mode<synchronous>, transform_indices = @transform_3, window_bounds = array<i64: 6, 6>}, {pipeline_mode = #tpu.pipeline_mode<synchronous>, transform_indices = @transform_4, window_bounds = array<i64: 6, 6>}, {pipeline_mode = #tpu.pipeline_mode<synchronous>, transform_indices = @transform_5, window_bounds = array<i64: 6, 6>}, {transform_indices = @transform_6, window_bounds = array<i64: 2, 1>}, {transform_indices = @transform_7, window_bounds = array<i64: 2, 8>}]} {
    %c0 = arith.constant 0 : index
    %c0_0 = arith.constant 0 : index
    %c0_1 = arith.constant 0 : index
    %0 = vector.load %arg1[%c0, %c0_0, %c0_1] : memref<2x8x6xf32, #tpu.memory_space<vmem>>, vector<2x8x6xf32>
    %c0_2 = arith.constant 0 : index
    %c0_3 = arith.constant 0 : index
    %1 = vector.load %arg2[%c0_2, %c0_3] : memref<2x8xi32, #tpu.memory_space<vmem>>, vector<2x8xi32>
    %c0_4 = arith.constant 0 : index
    %c0_5 = arith.constant 0 : index
    %2 = vector.load %arg3[%c0_4, %c0_5] : memref<2x8xi32, #tpu.memory_space<vmem>>, vector<2x8xi32>
    %c0_6 = arith.constant 0 : index
    %c0_7 = arith.constant 0 : index
    %3 = vector.load %arg4[%c0_6, %c0_7] : memref<6x6xf32, #tpu.memory_space<vmem>>, vector<6x6xf32>
    %c0_8 = arith.constant 0 : index
    %c0_9 = arith.constant 0 : index
    %4 = vector.load %arg5[%c0_8, %c0_9] : memref<6x6xf32, #tpu.memory_space<vmem>>, vector<6x6xf32>
    %c0_10 = arith.constant 0 : index
    %c0_11 = arith.constant 0 : index
    %5 = vector.load %arg6[%c0_10, %c0_11] : memref<6x6xf32, #tpu.memory_space<vmem>>, vector<6x6xf32>
    %6 = tpu.iota {dimensions = array<i32: 1>} : vector<2x6xi32>
    %7 = tpu.iota {dimensions = array<i32: 1>} : vector<2x8xi32>
    %8 = tpu.iota {dimensions = array<i32: 2>} : vector<2x8x6xi32>
    %9 = tpu.iota {dimensions = array<i32: 2>} : vector<1x1x6xi32>
    %10 = vector.shape_cast %4 : vector<6x6xf32> to vector<1x6x6xf32>
    %11 = vector.extract_strided_slice %3 {offsets = [1, 0], sizes = [1, 6], strides = [1, 1]} : vector<6x6xf32> to vector<1x6xf32>
    %12 = vector.extract_strided_slice %4 {offsets = [2, 0], sizes = [1, 6], strides = [1, 1]} : vector<6x6xf32> to vector<1x6xf32>
    %13 = arith.sitofp %2 : vector<2x8xi32> to vector<2x8xf32>
    %14 = vector.shape_cast %1 : vector<2x8xi32> to vector<2x8x1xi32>
    %15 = vector.broadcast %14 : vector<2x8x1xi32> to vector<2x8x6xi32>
    %16 = arith.cmpi eq, %8, %15 : vector<2x8x6xi32>
    %17 = arith.extui %16 : vector<2x8x6xi1> to vector<2x8x6xi32>
    %18 = arith.sitofp %17 : vector<2x8x6xi32> to vector<2x8x6xf32>
    %19 = arith.mulf %18, %0 : vector<2x8x6xf32>
    %cst = arith.constant dense<0.000000e+00> : vector<2x8xf32>
    %20 = vector.multi_reduction <add>, %19, %cst [2] : vector<2x8x6xf32> to vector<2x8xf32>
    %21 = vector.extract_strided_slice %18 {offsets = [0, 0, 0], sizes = [2, 1, 6], strides = [1, 1, 1]} : vector<2x8x6xf32> to vector<2x1x6xf32>
    %22 = vector.shape_cast %21 : vector<2x1x6xf32> to vector<2x6xf32>
    %23 = vector.broadcast %11 : vector<1x6xf32> to vector<2x6xf32>
    %24 = arith.mulf %22, %23 : vector<2x6xf32>
    %cst_12 = arith.constant dense<0.000000e+00> : vector<2xf32>
    %25 = vector.multi_reduction <add>, %24, %cst_12 [1] : vector<2x6xf32> to vector<2xf32>
    %26 = vector.shape_cast %25 : vector<2xf32> to vector<2x1xf32>
    %27 = vector.extract_strided_slice %20 {offsets = [0, 0], sizes = [2, 1], strides = [1, 1]} : vector<2x8xf32> to vector<2x1xf32>
    %28 = arith.addf %27, %26 : vector<2x1xf32>
    %29 = vector.shape_cast %3 : vector<6x6xf32> to vector<1x6x6xf32>
    %30 = vector.shape_cast %29 : vector<1x6x6xf32> to vector<1x6x6xf32>
    %31 = vector.broadcast %30 : vector<1x6x6xf32> to vector<2x6x6xf32>
    "tpu.trace_start"() <{level = 10 : i32, message = "blk,bkj->blj"}> : () -> ()
    %cst_13 = arith.constant dense<0.000000e+00> : vector<2x8x6xf32>
    %32 = tpu.matmul %18, %31, %cst_13 {dimension_numbers = #tpu.dot_dimension_numbers<[2], [1], [1], [2], [0, 0, 0, 1, 1, 2], [0], [0]>} : vector<2x8x6xf32>, vector<2x6x6xf32>, vector<2x8x6xf32> -> vector<2x8x6xf32>
    "tpu.trace_stop"() : () -> ()
    %33 = vector.extract_strided_slice %18 {offsets = [0, 1, 0], sizes = [2, 7, 6], strides = [1, 1, 1]} : vector<2x8x6xf32> to vector<2x7x6xf32>
    %34 = vector.extract_strided_slice %32 {offsets = [0, 0, 0], sizes = [2, 7, 6], strides = [1, 1, 1]} : vector<2x8x6xf32> to vector<2x7x6xf32>
    %35 = arith.mulf %33, %34 : vector<2x7x6xf32>
    %cst_14 = arith.constant dense<0.000000e+00> : vector<2x7xf32>
    %36 = vector.multi_reduction <add>, %35, %cst_14 [2] : vector<2x7x6xf32> to vector<2x7xf32>
    %37 = vector.extract_strided_slice %13 {offsets = [0, 1], sizes = [2, 7], strides = [1, 1]} : vector<2x8xf32> to vector<2x7xf32>
    %38 = vector.extract_strided_slice %20 {offsets = [0, 1], sizes = [2, 7], strides = [1, 1]} : vector<2x8xf32> to vector<2x7xf32>
    %39 = arith.addf %38, %36 : vector<2x7xf32>
    %40 = arith.mulf %37, %39 : vector<2x7xf32>
    %cst_15 = arith.constant dense<0.000000e+00> : vector<2xf32>
    %41 = vector.multi_reduction <add>, %40, %cst_15 [1] : vector<2x7xf32> to vector<2xf32>
    %42 = vector.shape_cast %41 : vector<2xf32> to vector<2x1xf32>
    %43 = arith.addf %28, %42 : vector<2x1xf32>
    %cst_16 = arith.constant dense<0> : vector<2xi32>
    %44 = vector.multi_reduction <add>, %2, %cst_16 [1] : vector<2x8xi32> to vector<2xi32>
    %45 = vector.shape_cast %44 : vector<2xi32> to vector<2x1xi32>
    %c1_i32 = arith.constant 1 : i32
    %46 = vector.broadcast %c1_i32 : i32 to vector<2x1xi32>
    %47 = arith.subi %45, %46 : vector<2x1xi32>
    %48 = vector.broadcast %47 : vector<2x1xi32> to vector<2x8xi32>
    %49 = arith.cmpi eq, %7, %48 : vector<2x8xi32>
    %c0_i32 = arith.constant 0 : i32
    %50 = vector.broadcast %c0_i32 : i32 to vector<2x8xi32>
    %51 = arith.select %49, %1, %50 : vector<2x8xi1>, vector<2x8xi32>
    %cst_17 = arith.constant dense<0> : vector<2xi32>
    %52 = vector.multi_reduction <add>, %51, %cst_17 [1] : vector<2x8xi32> to vector<2xi32>
    %53 = vector.shape_cast %52 : vector<2xi32> to vector<2x1xi32>
    %54 = vector.broadcast %53 : vector<2x1xi32> to vector<2x6xi32>
    %55 = arith.cmpi eq, %6, %54 : vector<2x6xi32>
    %56 = arith.extui %55 : vector<2x6xi1> to vector<2x6xi32>
    %57 = arith.sitofp %56 : vector<2x6xi32> to vector<2x6xf32>
    %58 = vector.broadcast %12 : vector<1x6xf32> to vector<2x6xf32>
    %59 = arith.mulf %57, %58 : vector<2x6xf32>
    %cst_18 = arith.constant dense<0.000000e+00> : vector<2xf32>
    %60 = vector.multi_reduction <add>, %59, %cst_18 [1] : vector<2x6xf32> to vector<2xf32>
    %61 = vector.shape_cast %60 : vector<2xf32> to vector<2x1xf32>
    %62 = arith.addf %43, %61 : vector<2x1xf32>
    %63 = vector.extract_strided_slice %0 {offsets = [0, 0, 0], sizes = [2, 1, 6], strides = [1, 1, 1]} : vector<2x8x6xf32> to vector<2x1x6xf32>
    %64 = vector.shape_cast %63 : vector<2x1x6xf32> to vector<2x6xf32>
    %65 = vector.broadcast %11 : vector<1x6xf32> to vector<2x6xf32>
    %66 = arith.addf %65, %64 : vector<2x6xf32>
    %67 = vector.extract_strided_slice %0 {offsets = [0, 1, 0], sizes = [2, 1, 6], strides = [1, 1, 1]} : vector<2x8x6xf32> to vector<2x1x6xf32>
    %68 = vector.shape_cast %67 : vector<2x1x6xf32> to vector<2x6xf32>
    %69 = vector.extract_strided_slice %2 {offsets = [0, 1], sizes = [2, 1], strides = [1, 1]} : vector<2x8xi32> to vector<2x1xi32>
    %c0_i32_19 = arith.constant 0 : i32
    %70 = vector.broadcast %c0_i32_19 : i32 to vector<2x1xi32>
    %71 = arith.cmpi sgt, %69, %70 : vector<2x1xi32>
    %cst_20 = arith.constant dense<0xFF800000> : vector<2xf32>
    %72 = vector.multi_reduction <maximumf>, %66, %cst_20 [1] : vector<2x6xf32> to vector<2xf32>
    %73 = vector.shape_cast %72 : vector<2xf32> to vector<2x1xf32>
    %74 = vector.broadcast %73 : vector<2x1xf32> to vector<2x6xf32>
    %75 = arith.subf %66, %74 : vector<2x6xf32>
    %76 = math.exp %75 : vector<2x6xf32>
    %cst_21 = arith.constant dense<0.000000e+00> : vector<2x6xf32>
    %77 = tpu.matmul %76, %5, %cst_21 {dimension_numbers = #tpu.dot_dimension_numbers<[1], [0], [0], [1], [0, 0, 1, 1], [], []>} : vector<2x6xf32>, vector<6x6xf32>, vector<2x6xf32> -> vector<2x6xf32>
    %78 = vector.broadcast %73 : vector<2x1xf32> to vector<2x6xf32>
    %79 = arith.addf %68, %78 : vector<2x6xf32>
    %80 = math.log %77 : vector<2x6xf32>
    %81 = arith.addf %79, %80 : vector<2x6xf32>
    %82 = vector.shape_cast %71 : vector<2x1xi1> to vector<2x1xi1>
    %83 = vector.broadcast %82 : vector<2x1xi1> to vector<2x6xi1>
    %84 = arith.select %83, %81, %66 : vector<2x6xi1>, vector<2x6xf32>
    %85 = vector.shape_cast %66 : vector<2x6xf32> to vector<2x1x6xf32>
    %86 = vector.broadcast %85 : vector<2x1x6xf32> to vector<2x6x6xf32>
    %87 = vector.broadcast %10 : vector<1x6x6xf32> to vector<2x6x6xf32>
    %88 = arith.addf %86, %87 : vector<2x6x6xf32>
    %cst_22 = arith.constant dense<0xFF800000> : vector<2x6xf32>
    %89 = vector.multi_reduction <maximumf>, %88, %cst_22 [2] : vector<2x6x6xf32> to vector<2x6xf32>
    %90 = vector.shape_cast %89 : vector<2x6xf32> to vector<2x6x1xf32>
    %91 = vector.broadcast %90 : vector<2x6x1xf32> to vector<2x6x6xf32>
    %92 = arith.cmpf oeq, %88, %91 : vector<2x6x6xf32>
    %c6_i32 = arith.constant 6 : i32
    %93 = vector.shape_cast %9 : vector<1x1x6xi32> to vector<1x1x6xi32>
    %94 = vector.broadcast %93 : vector<1x1x6xi32> to vector<2x6x6xi32>
    %95 = vector.broadcast %c6_i32 : i32 to vector<2x6x6xi32>
    %96 = arith.select %92, %94, %95 : vector<2x6x6xi1>, vector<2x6x6xi32>
    %cst_23 = arith.constant dense<2147483647> : vector<2x6xi32>
    %97 = vector.multi_reduction <minsi>, %96, %cst_23 [2] : vector<2x6x6xi32> to vector<2x6xi32>
    %c0_24 = arith.constant 0 : index
    %c0_25 = arith.constant 0 : index
    %c0_26 = arith.constant 0 : index
    %98 = vector.load %arg9[%c0_24, %c0_25, %c0_26] : memref<7x2x6xi32, #tpu.memory_space<vmem>>, vector<1x2x6xi32>
    %99 = vector.shape_cast %98 : vector<1x2x6xi32> to vector<2x6xi32>
    %100 = vector.shape_cast %97 : vector<2x6xi32> to vector<1x2x6xi32>
    tpu.vector_store %arg9[%c0_24, %c0_25, %c0_26], %100 {strides = array<i32>} : memref<7x2x6xi32, #tpu.memory_space<vmem>>, vector<1x2x6xi32>,
    %101 = arith.addf %89, %68 : vector<2x6xf32>
    %102 = vector.shape_cast %71 : vector<2x1xi1> to vector<2x1xi1>
    %103 = vector.broadcast %102 : vector<2x1xi1> to vector<2x6xi1>
    %104 = arith.select %103, %101, %66 : vector<2x6xi1>, vector<2x6xf32>
    %105 = vector.extract_strided_slice %0 {offsets = [0, 2, 0], sizes = [2, 1, 6], strides = [1, 1, 1]} : vector<2x8x6xf32> to vector<2x1x6xf32>
    %106 = vector.shape_cast %105 : vector<2x1x6xf32> to vector<2x6xf32>
    %107 = vector.extract_strided_slice %2 {offsets = [0, 2], sizes = [2, 1], strides = [1, 1]} : vector<2x8xi32> to vector<2x1xi32>
    %c0_i32_27 = arith.constant 0 : i32
    %108 = vector.broadcast %c0_i32_27 : i32 to vector<2x1xi32>
    %109 = arith.cmpi sgt, %107, %108 : vector<2x1xi32>
    %cst_28 = arith.constant dense<0xFF800000> : vector<2xf32>
    %110 = vector.multi_reduction <maximumf>, %84, %cst_28 [1] : vector<2x6xf32> to vector<2xf32>
    %111 = vector.shape_cast %110 : vector<2xf32> to vector<2x1xf32>
    %112 = vector.broadcast %111 : vector<2x1xf32> to vector<2x6xf32>
    %113 = arith.subf %84, %112 : vector<2x6xf32>
    %114 = math.exp %113 : vector<2x6xf32>
    %cst_29 = arith.constant dense<0.000000e+00> : vector<2x6xf32>
    %115 = tpu.matmul %114, %5, %cst_29 {dimension_numbers = #tpu.dot_dimension_numbers<[1], [0], [0], [1], [0, 0, 1, 1], [], []>} : vector<2x6xf32>, vector<6x6xf32>, vector<2x6xf32> -> vector<2x6xf32>
    %116 = vector.broadcast %111 : vector<2x1xf32> to vector<2x6xf32>
    %117 = arith.addf %106, %116 : vector<2x6xf32>
    %118 = math.log %115 : vector<2x6xf32>
    %119 = arith.addf %117, %118 : vector<2x6xf32>
    %120 = vector.shape_cast %109 : vector<2x1xi1> to vector<2x1xi1>
    %121 = vector.broadcast %120 : vector<2x1xi1> to vector<2x6xi1>
    %122 = arith.select %121, %119, %84 : vector<2x6xi1>, vector<2x6xf32>
    %123 = vector.shape_cast %104 : vector<2x6xf32> to vector<2x1x6xf32>
    %124 = vector.broadcast %123 : vector<2x1x6xf32> to vector<2x6x6xf32>
    %125 = vector.broadcast %10 : vector<1x6x6xf32> to vector<2x6x6xf32>
    %126 = arith.addf %124, %125 : vector<2x6x6xf32>
    %cst_30 = arith.constant dense<0xFF800000> : vector<2x6xf32>
    %127 = vector.multi_reduction <maximumf>, %126, %cst_30 [2] : vector<2x6x6xf32> to vector<2x6xf32>
    %128 = vector.shape_cast %127 : vector<2x6xf32> to vector<2x6x1xf32>
    %129 = vector.broadcast %128 : vector<2x6x1xf32> to vector<2x6x6xf32>
    %130 = arith.cmpf oeq, %126, %129 : vector<2x6x6xf32>
    %c6_i32_31 = arith.constant 6 : i32
    %131 = vector.shape_cast %9 : vector<1x1x6xi32> to vector<1x1x6xi32>
    %132 = vector.broadcast %131 : vector<1x1x6xi32> to vector<2x6x6xi32>
    %133 = vector.broadcast %c6_i32_31 : i32 to vector<2x6x6xi32>
    %134 = arith.select %130, %132, %133 : vector<2x6x6xi1>, vector<2x6x6xi32>
    %cst_32 = arith.constant dense<2147483647> : vector<2x6xi32>
    %135 = vector.multi_reduction <minsi>, %134, %cst_32 [2] : vector<2x6x6xi32> to vector<2x6xi32>
    %c1 = arith.constant 1 : index
    %c0_33 = arith.constant 0 : index
    %c0_34 = arith.constant 0 : index
    %136 = vector.load %arg9[%c1, %c0_33, %c0_34] : memref<7x2x6xi32, #tpu.memory_space<vmem>>, vector<1x2x6xi32>
    %137 = vector.shape_cast %136 : vector<1x2x6xi32> to vector<2x6xi32>
    %138 = vector.shape_cast %135 : vector<2x6xi32> to vector<1x2x6xi32>
    tpu.vector_store %arg9[%c1, %c0_33, %c0_34], %138 {strides = array<i32>} : memref<7x2x6xi32, #tpu.memory_space<vmem>>, vector<1x2x6xi32>,
    %139 = arith.addf %127, %106 : vector<2x6xf32>
    %140 = vector.shape_cast %109 : vector<2x1xi1> to vector<2x1xi1>
    %141 = vector.broadcast %140 : vector<2x1xi1> to vector<2x6xi1>
    %142 = arith.select %141, %139, %104 : vector<2x6xi1>, vector<2x6xf32>
    %143 = vector.extract_strided_slice %0 {offsets = [0, 3, 0], sizes = [2, 1, 6], strides = [1, 1, 1]} : vector<2x8x6xf32> to vector<2x1x6xf32>
    %144 = vector.shape_cast %143 : vector<2x1x6xf32> to vector<2x6xf32>
    %145 = vector.extract_strided_slice %2 {offsets = [0, 3], sizes = [2, 1], strides = [1, 1]} : vector<2x8xi32> to vector<2x1xi32>
    %c0_i32_35 = arith.constant 0 : i32
    %146 = vector.broadcast %c0_i32_35 : i32 to vector<2x1xi32>
    %147 = arith.cmpi sgt, %145, %146 : vector<2x1xi32>
    %cst_36 = arith.constant dense<0xFF800000> : vector<2xf32>
    %148 = vector.multi_reduction <maximumf>, %122, %cst_36 [1] : vector<2x6xf32> to vector<2xf32>
    %149 = vector.shape_cast %148 : vector<2xf32> to vector<2x1xf32>
    %150 = vector.broadcast %149 : vector<2x1xf32> to vector<2x6xf32>
    %151 = arith.subf %122, %150 : vector<2x6xf32>
    %152 = math.exp %151 : vector<2x6xf32>
    %cst_37 = arith.constant dense<0.000000e+00> : vector<2x6xf32>
    %153 = tpu.matmul %152, %5, %cst_37 {dimension_numbers = #tpu.dot_dimension_numbers<[1], [0], [0], [1], [0, 0, 1, 1], [], []>} : vector<2x6xf32>, vector<6x6xf32>, vector<2x6xf32> -> vector<2x6xf32>
    %154 = vector.broadcast %149 : vector<2x1xf32> to vector<2x6xf32>
    %155 = arith.addf %144, %154 : vector<2x6xf32>
    %156 = math.log %153 : vector<2x6xf32>
    %157 = arith.addf %155, %156 : vector<2x6xf32>
    %158 = vector.shape_cast %147 : vector<2x1xi1> to vector<2x1xi1>
    %159 = vector.broadcast %158 : vector<2x1xi1> to vector<2x6xi1>
    %160 = arith.select %159, %157, %122 : vector<2x6xi1>, vector<2x6xf32>
    %161 = vector.shape_cast %142 : vector<2x6xf32> to vector<2x1x6xf32>
    %162 = vector.broadcast %161 : vector<2x1x6xf32> to vector<2x6x6xf32>
    %163 = vector.broadcast %10 : vector<1x6x6xf32> to vector<2x6x6xf32>
    %164 = arith.addf %162, %163 : vector<2x6x6xf32>
    %cst_38 = arith.constant dense<0xFF800000> : vector<2x6xf32>
    %165 = vector.multi_reduction <maximumf>, %164, %cst_38 [2] : vector<2x6x6xf32> to vector<2x6xf32>
    %166 = vector.shape_cast %165 : vector<2x6xf32> to vector<2x6x1xf32>
    %167 = vector.broadcast %166 : vector<2x6x1xf32> to vector<2x6x6xf32>
    %168 = arith.cmpf oeq, %164, %167 : vector<2x6x6xf32>
    %c6_i32_39 = arith.constant 6 : i32
    %169 = vector.shape_cast %9 : vector<1x1x6xi32> to vector<1x1x6xi32>
    %170 = vector.broadcast %169 : vector<1x1x6xi32> to vector<2x6x6xi32>
    %171 = vector.broadcast %c6_i32_39 : i32 to vector<2x6x6xi32>
    %172 = arith.select %168, %170, %171 : vector<2x6x6xi1>, vector<2x6x6xi32>
    %cst_40 = arith.constant dense<2147483647> : vector<2x6xi32>
    %173 = vector.multi_reduction <minsi>, %172, %cst_40 [2] : vector<2x6x6xi32> to vector<2x6xi32>
    %c2 = arith.constant 2 : index
    %c0_41 = arith.constant 0 : index
    %c0_42 = arith.constant 0 : index
    %174 = vector.load %arg9[%c2, %c0_41, %c0_42] : memref<7x2x6xi32, #tpu.memory_space<vmem>>, vector<1x2x6xi32>
    %175 = vector.shape_cast %174 : vector<1x2x6xi32> to vector<2x6xi32>
    %176 = vector.shape_cast %173 : vector<2x6xi32> to vector<1x2x6xi32>
    tpu.vector_store %arg9[%c2, %c0_41, %c0_42], %176 {strides = array<i32>} : memref<7x2x6xi32, #tpu.memory_space<vmem>>, vector<1x2x6xi32>,
    %177 = arith.addf %165, %144 : vector<2x6xf32>
    %178 = vector.shape_cast %147 : vector<2x1xi1> to vector<2x1xi1>
    %179 = vector.broadcast %178 : vector<2x1xi1> to vector<2x6xi1>
    %180 = arith.select %179, %177, %142 : vector<2x6xi1>, vector<2x6xf32>
    %181 = vector.extract_strided_slice %0 {offsets = [0, 4, 0], sizes = [2, 1, 6], strides = [1, 1, 1]} : vector<2x8x6xf32> to vector<2x1x6xf32>
    %182 = vector.shape_cast %181 : vector<2x1x6xf32> to vector<2x6xf32>
    %183 = vector.extract_strided_slice %2 {offsets = [0, 4], sizes = [2, 1], strides = [1, 1]} : vector<2x8xi32> to vector<2x1xi32>
    %c0_i32_43 = arith.constant 0 : i32
    %184 = vector.broadcast %c0_i32_43 : i32 to vector<2x1xi32>
    %185 = arith.cmpi sgt, %183, %184 : vector<2x1xi32>
    %cst_44 = arith.constant dense<0xFF800000> : vector<2xf32>
    %186 = vector.multi_reduction <maximumf>, %160, %cst_44 [1] : vector<2x6xf32> to vector<2xf32>
    %187 = vector.shape_cast %186 : vector<2xf32> to vector<2x1xf32>
    %188 = vector.broadcast %187 : vector<2x1xf32> to vector<2x6xf32>
    %189 = arith.subf %160, %188 : vector<2x6xf32>
    %190 = math.exp %189 : vector<2x6xf32>
    %cst_45 = arith.constant dense<0.000000e+00> : vector<2x6xf32>
    %191 = tpu.matmul %190, %5, %cst_45 {dimension_numbers = #tpu.dot_dimension_numbers<[1], [0], [0], [1], [0, 0, 1, 1], [], []>} : vector<2x6xf32>, vector<6x6xf32>, vector<2x6xf32> -> vector<2x6xf32>
    %192 = vector.broadcast %187 : vector<2x1xf32> to vector<2x6xf32>
    %193 = arith.addf %182, %192 : vector<2x6xf32>
    %194 = math.log %191 : vector<2x6xf32>
    %195 = arith.addf %193, %194 : vector<2x6xf32>
    %196 = vector.shape_cast %185 : vector<2x1xi1> to vector<2x1xi1>
    %197 = vector.broadcast %196 : vector<2x1xi1> to vector<2x6xi1>
    %198 = arith.select %197, %195, %160 : vector<2x6xi1>, vector<2x6xf32>
    %199 = vector.shape_cast %180 : vector<2x6xf32> to vector<2x1x6xf32>
    %200 = vector.broadcast %199 : vector<2x1x6xf32> to vector<2x6x6xf32>
    %201 = vector.broadcast %10 : vector<1x6x6xf32> to vector<2x6x6xf32>
    %202 = arith.addf %200, %201 : vector<2x6x6xf32>
    %cst_46 = arith.constant dense<0xFF800000> : vector<2x6xf32>
    %203 = vector.multi_reduction <maximumf>, %202, %cst_46 [2] : vector<2x6x6xf32> to vector<2x6xf32>
    %204 = vector.shape_cast %203 : vector<2x6xf32> to vector<2x6x1xf32>
    %205 = vector.broadcast %204 : vector<2x6x1xf32> to vector<2x6x6xf32>
    %206 = arith.cmpf oeq, %202, %205 : vector<2x6x6xf32>
    %c6_i32_47 = arith.constant 6 : i32
    %207 = vector.shape_cast %9 : vector<1x1x6xi32> to vector<1x1x6xi32>
    %208 = vector.broadcast %207 : vector<1x1x6xi32> to vector<2x6x6xi32>
    %209 = vector.broadcast %c6_i32_47 : i32 to vector<2x6x6xi32>
    %210 = arith.select %206, %208, %209 : vector<2x6x6xi1>, vector<2x6x6xi32>
    %cst_48 = arith.constant dense<2147483647> : vector<2x6xi32>
    %211 = vector.multi_reduction <minsi>, %210, %cst_48 [2] : vector<2x6x6xi32> to vector<2x6xi32>
    %c3 = arith.constant 3 : index
    %c0_49 = arith.constant 0 : index
    %c0_50 = arith.constant 0 : index
    %212 = vector.load %arg9[%c3, %c0_49, %c0_50] : memref<7x2x6xi32, #tpu.memory_space<vmem>>, vector<1x2x6xi32>
    %213 = vector.shape_cast %212 : vector<1x2x6xi32> to vector<2x6xi32>
    %214 = vector.shape_cast %211 : vector<2x6xi32> to vector<1x2x6xi32>
    tpu.vector_store %arg9[%c3, %c0_49, %c0_50], %214 {strides = array<i32>} : memref<7x2x6xi32, #tpu.memory_space<vmem>>, vector<1x2x6xi32>,
    %215 = arith.addf %203, %182 : vector<2x6xf32>
    %216 = vector.shape_cast %185 : vector<2x1xi1> to vector<2x1xi1>
    %217 = vector.broadcast %216 : vector<2x1xi1> to vector<2x6xi1>
    %218 = arith.select %217, %215, %180 : vector<2x6xi1>, vector<2x6xf32>
    %219 = vector.extract_strided_slice %0 {offsets = [0, 5, 0], sizes = [2, 1, 6], strides = [1, 1, 1]} : vector<2x8x6xf32> to vector<2x1x6xf32>
    %220 = vector.shape_cast %219 : vector<2x1x6xf32> to vector<2x6xf32>
    %221 = vector.extract_strided_slice %2 {offsets = [0, 5], sizes = [2, 1], strides = [1, 1]} : vector<2x8xi32> to vector<2x1xi32>
    %c0_i32_51 = arith.constant 0 : i32
    %222 = vector.broadcast %c0_i32_51 : i32 to vector<2x1xi32>
    %223 = arith.cmpi sgt, %221, %222 : vector<2x1xi32>
    %cst_52 = arith.constant dense<0xFF800000> : vector<2xf32>
    %224 = vector.multi_reduction <maximumf>, %198, %cst_52 [1] : vector<2x6xf32> to vector<2xf32>
    %225 = vector.shape_cast %224 : vector<2xf32> to vector<2x1xf32>
    %226 = vector.broadcast %225 : vector<2x1xf32> to vector<2x6xf32>
    %227 = arith.subf %198, %226 : vector<2x6xf32>
    %228 = math.exp %227 : vector<2x6xf32>
    %cst_53 = arith.constant dense<0.000000e+00> : vector<2x6xf32>
    %229 = tpu.matmul %228, %5, %cst_53 {dimension_numbers = #tpu.dot_dimension_numbers<[1], [0], [0], [1], [0, 0, 1, 1], [], []>} : vector<2x6xf32>, vector<6x6xf32>, vector<2x6xf32> -> vector<2x6xf32>
    %230 = vector.broadcast %225 : vector<2x1xf32> to vector<2x6xf32>
    %231 = arith.addf %220, %230 : vector<2x6xf32>
    %232 = math.log %229 : vector<2x6xf32>
    %233 = arith.addf %231, %232 : vector<2x6xf32>
    %234 = vector.shape_cast %223 : vector<2x1xi1> to vector<2x1xi1>
    %235 = vector.broadcast %234 : vector<2x1xi1> to vector<2x6xi1>
    %236 = arith.select %235, %233, %198 : vector<2x6xi1>, vector<2x6xf32>
    %237 = vector.shape_cast %218 : vector<2x6xf32> to vector<2x1x6xf32>
    %238 = vector.broadcast %237 : vector<2x1x6xf32> to vector<2x6x6xf32>
    %239 = vector.broadcast %10 : vector<1x6x6xf32> to vector<2x6x6xf32>
    %240 = arith.addf %238, %239 : vector<2x6x6xf32>
    %cst_54 = arith.constant dense<0xFF800000> : vector<2x6xf32>
    %241 = vector.multi_reduction <maximumf>, %240, %cst_54 [2] : vector<2x6x6xf32> to vector<2x6xf32>
    %242 = vector.shape_cast %241 : vector<2x6xf32> to vector<2x6x1xf32>
    %243 = vector.broadcast %242 : vector<2x6x1xf32> to vector<2x6x6xf32>
    %244 = arith.cmpf oeq, %240, %243 : vector<2x6x6xf32>
    %c6_i32_55 = arith.constant 6 : i32
    %245 = vector.shape_cast %9 : vector<1x1x6xi32> to vector<1x1x6xi32>
    %246 = vector.broadcast %245 : vector<1x1x6xi32> to vector<2x6x6xi32>
    %247 = vector.broadcast %c6_i32_55 : i32 to vector<2x6x6xi32>
    %248 = arith.select %244, %246, %247 : vector<2x6x6xi1>, vector<2x6x6xi32>
    %cst_56 = arith.constant dense<2147483647> : vector<2x6xi32>
    %249 = vector.multi_reduction <minsi>, %248, %cst_56 [2] : vector<2x6x6xi32> to vector<2x6xi32>
    %c4 = arith.constant 4 : index
    %c0_57 = arith.constant 0 : index
    %c0_58 = arith.constant 0 : index
    %250 = vector.load %arg9[%c4, %c0_57, %c0_58] : memref<7x2x6xi32, #tpu.memory_space<vmem>>, vector<1x2x6xi32>
    %251 = vector.shape_cast %250 : vector<1x2x6xi32> to vector<2x6xi32>
    %252 = vector.shape_cast %249 : vector<2x6xi32> to vector<1x2x6xi32>
    tpu.vector_store %arg9[%c4, %c0_57, %c0_58], %252 {strides = array<i32>} : memref<7x2x6xi32, #tpu.memory_space<vmem>>, vector<1x2x6xi32>,
    %253 = arith.addf %241, %220 : vector<2x6xf32>
    %254 = vector.shape_cast %223 : vector<2x1xi1> to vector<2x1xi1>
    %255 = vector.broadcast %254 : vector<2x1xi1> to vector<2x6xi1>
    %256 = arith.select %255, %253, %218 : vector<2x6xi1>, vector<2x6xf32>
    %257 = vector.extract_strided_slice %0 {offsets = [0, 6, 0], sizes = [2, 1, 6], strides = [1, 1, 1]} : vector<2x8x6xf32> to vector<2x1x6xf32>
    %258 = vector.shape_cast %257 : vector<2x1x6xf32> to vector<2x6xf32>
    %259 = vector.extract_strided_slice %2 {offsets = [0, 6], sizes = [2, 1], strides = [1, 1]} : vector<2x8xi32> to vector<2x1xi32>
    %c0_i32_59 = arith.constant 0 : i32
    %260 = vector.broadcast %c0_i32_59 : i32 to vector<2x1xi32>
    %261 = arith.cmpi sgt, %259, %260 : vector<2x1xi32>
    %cst_60 = arith.constant dense<0xFF800000> : vector<2xf32>
    %262 = vector.multi_reduction <maximumf>, %236, %cst_60 [1] : vector<2x6xf32> to vector<2xf32>
    %263 = vector.shape_cast %262 : vector<2xf32> to vector<2x1xf32>
    %264 = vector.broadcast %263 : vector<2x1xf32> to vector<2x6xf32>
    %265 = arith.subf %236, %264 : vector<2x6xf32>
    %266 = math.exp %265 : vector<2x6xf32>
    %cst_61 = arith.constant dense<0.000000e+00> : vector<2x6xf32>
    %267 = tpu.matmul %266, %5, %cst_61 {dimension_numbers = #tpu.dot_dimension_numbers<[1], [0], [0], [1], [0, 0, 1, 1], [], []>} : vector<2x6xf32>, vector<6x6xf32>, vector<2x6xf32> -> vector<2x6xf32>
    %268 = vector.broadcast %263 : vector<2x1xf32> to vector<2x6xf32>
    %269 = arith.addf %258, %268 : vector<2x6xf32>
    %270 = math.log %267 : vector<2x6xf32>
    %271 = arith.addf %269, %270 : vector<2x6xf32>
    %272 = vector.shape_cast %261 : vector<2x1xi1> to vector<2x1xi1>
    %273 = vector.broadcast %272 : vector<2x1xi1> to vector<2x6xi1>
    %274 = arith.select %273, %271, %236 : vector<2x6xi1>, vector<2x6xf32>
    %275 = vector.shape_cast %256 : vector<2x6xf32> to vector<2x1x6xf32>
    %276 = vector.broadcast %275 : vector<2x1x6xf32> to vector<2x6x6xf32>
    %277 = vector.broadcast %10 : vector<1x6x6xf32> to vector<2x6x6xf32>
    %278 = arith.addf %276, %277 : vector<2x6x6xf32>
    %cst_62 = arith.constant dense<0xFF800000> : vector<2x6xf32>
    %279 = vector.multi_reduction <maximumf>, %278, %cst_62 [2] : vector<2x6x6xf32> to vector<2x6xf32>
    %280 = vector.shape_cast %279 : vector<2x6xf32> to vector<2x6x1xf32>
    %281 = vector.broadcast %280 : vector<2x6x1xf32> to vector<2x6x6xf32>
    %282 = arith.cmpf oeq, %278, %281 : vector<2x6x6xf32>
    %c6_i32_63 = arith.constant 6 : i32
    %283 = vector.shape_cast %9 : vector<1x1x6xi32> to vector<1x1x6xi32>
    %284 = vector.broadcast %283 : vector<1x1x6xi32> to vector<2x6x6xi32>
    %285 = vector.broadcast %c6_i32_63 : i32 to vector<2x6x6xi32>
    %286 = arith.select %282, %284, %285 : vector<2x6x6xi1>, vector<2x6x6xi32>
    %cst_64 = arith.constant dense<2147483647> : vector<2x6xi32>
    %287 = vector.multi_reduction <minsi>, %286, %cst_64 [2] : vector<2x6x6xi32> to vector<2x6xi32>
    %c5 = arith.constant 5 : index
    %c0_65 = arith.constant 0 : index
    %c0_66 = arith.constant 0 : index
    %288 = vector.load %arg9[%c5, %c0_65, %c0_66] : memref<7x2x6xi32, #tpu.memory_space<vmem>>, vector<1x2x6xi32>
    %289 = vector.shape_cast %288 : vector<1x2x6xi32> to vector<2x6xi32>
    %290 = vector.shape_cast %287 : vector<2x6xi32> to vector<1x2x6xi32>
    tpu.vector_store %arg9[%c5, %c0_65, %c0_66], %290 {strides = array<i32>} : memref<7x2x6xi32, #tpu.memory_space<vmem>>, vector<1x2x6xi32>,
    %291 = arith.addf %279, %258 : vector<2x6xf32>
    %292 = vector.shape_cast %261 : vector<2x1xi1> to vector<2x1xi1>
    %293 = vector.broadcast %292 : vector<2x1xi1> to vector<2x6xi1>
    %294 = arith.select %293, %291, %256 : vector<2x6xi1>, vector<2x6xf32>
    %295 = vector.extract_strided_slice %0 {offsets = [0, 7, 0], sizes = [2, 1, 6], strides = [1, 1, 1]} : vector<2x8x6xf32> to vector<2x1x6xf32>
    %296 = vector.shape_cast %295 : vector<2x1x6xf32> to vector<2x6xf32>
    %297 = vector.extract_strided_slice %2 {offsets = [0, 7], sizes = [2, 1], strides = [1, 1]} : vector<2x8xi32> to vector<2x1xi32>
    %c0_i32_67 = arith.constant 0 : i32
    %298 = vector.broadcast %c0_i32_67 : i32 to vector<2x1xi32>
    %299 = arith.cmpi sgt, %297, %298 : vector<2x1xi32>
    %cst_68 = arith.constant dense<0xFF800000> : vector<2xf32>
    %300 = vector.multi_reduction <maximumf>, %274, %cst_68 [1] : vector<2x6xf32> to vector<2xf32>
    %301 = vector.shape_cast %300 : vector<2xf32> to vector<2x1xf32>
    %302 = vector.broadcast %301 : vector<2x1xf32> to vector<2x6xf32>
    %303 = arith.subf %274, %302 : vector<2x6xf32>
    %304 = math.exp %303 : vector<2x6xf32>
    %cst_69 = arith.constant dense<0.000000e+00> : vector<2x6xf32>
    %305 = tpu.matmul %304, %5, %cst_69 {dimension_numbers = #tpu.dot_dimension_numbers<[1], [0], [0], [1], [0, 0, 1, 1], [], []>} : vector<2x6xf32>, vector<6x6xf32>, vector<2x6xf32> -> vector<2x6xf32>
    %306 = vector.broadcast %301 : vector<2x1xf32> to vector<2x6xf32>
    %307 = arith.addf %296, %306 : vector<2x6xf32>
    %308 = math.log %305 : vector<2x6xf32>
    %309 = arith.addf %307, %308 : vector<2x6xf32>
    %310 = vector.shape_cast %299 : vector<2x1xi1> to vector<2x1xi1>
    %311 = vector.broadcast %310 : vector<2x1xi1> to vector<2x6xi1>
    %312 = arith.select %311, %309, %274 : vector<2x6xi1>, vector<2x6xf32>
    %313 = vector.shape_cast %294 : vector<2x6xf32> to vector<2x1x6xf32>
    %314 = vector.broadcast %313 : vector<2x1x6xf32> to vector<2x6x6xf32>
    %315 = vector.broadcast %10 : vector<1x6x6xf32> to vector<2x6x6xf32>
    %316 = arith.addf %314, %315 : vector<2x6x6xf32>
    %cst_70 = arith.constant dense<0xFF800000> : vector<2x6xf32>
    %317 = vector.multi_reduction <maximumf>, %316, %cst_70 [2] : vector<2x6x6xf32> to vector<2x6xf32>
    %318 = vector.shape_cast %317 : vector<2x6xf32> to vector<2x6x1xf32>
    %319 = vector.broadcast %318 : vector<2x6x1xf32> to vector<2x6x6xf32>
    %320 = arith.cmpf oeq, %316, %319 : vector<2x6x6xf32>
    %c6_i32_71 = arith.constant 6 : i32
    %321 = vector.shape_cast %9 : vector<1x1x6xi32> to vector<1x1x6xi32>
    %322 = vector.broadcast %321 : vector<1x1x6xi32> to vector<2x6x6xi32>
    %323 = vector.broadcast %c6_i32_71 : i32 to vector<2x6x6xi32>
    %324 = arith.select %320, %322, %323 : vector<2x6x6xi1>, vector<2x6x6xi32>
    %cst_72 = arith.constant dense<2147483647> : vector<2x6xi32>
    %325 = vector.multi_reduction <minsi>, %324, %cst_72 [2] : vector<2x6x6xi32> to vector<2x6xi32>
    %c6 = arith.constant 6 : index
    %c0_73 = arith.constant 0 : index
    %c0_74 = arith.constant 0 : index
    %326 = vector.load %arg9[%c6, %c0_73, %c0_74] : memref<7x2x6xi32, #tpu.memory_space<vmem>>, vector<1x2x6xi32>
    %327 = vector.shape_cast %326 : vector<1x2x6xi32> to vector<2x6xi32>
    %328 = vector.shape_cast %325 : vector<2x6xi32> to vector<1x2x6xi32>
    tpu.vector_store %arg9[%c6, %c0_73, %c0_74], %328 {strides = array<i32>} : memref<7x2x6xi32, #tpu.memory_space<vmem>>, vector<1x2x6xi32>,
    %329 = arith.addf %317, %296 : vector<2x6xf32>
    %330 = vector.shape_cast %299 : vector<2x1xi1> to vector<2x1xi1>
    %331 = vector.broadcast %330 : vector<2x1xi1> to vector<2x6xi1>
    %332 = arith.select %331, %329, %294 : vector<2x6xi1>, vector<2x6xf32>
    %333 = vector.broadcast %12 : vector<1x6xf32> to vector<2x6xf32>
    %334 = arith.addf %312, %333 : vector<2x6xf32>
    %cst_75 = arith.constant dense<0xFF800000> : vector<2xf32>
    %335 = vector.multi_reduction <maximumf>, %334, %cst_75 [1] : vector<2x6xf32> to vector<2xf32>
    %336 = vector.shape_cast %335 : vector<2xf32> to vector<2x1xf32>
    %337 = vector.broadcast %336 : vector<2x1xf32> to vector<2x6xf32>
    %338 = arith.subf %334, %337 : vector<2x6xf32>
    %339 = math.exp %338 : vector<2x6xf32>
    %cst_76 = arith.constant dense<0.000000e+00> : vector<2xf32>
    %340 = vector.multi_reduction <add>, %339, %cst_76 [1] : vector<2x6xf32> to vector<2xf32>
    %341 = vector.shape_cast %340 : vector<2xf32> to vector<2x1xf32>
    %342 = math.log %341 : vector<2x1xf32>
    %343 = arith.addf %336, %342 : vector<2x1xf32>
    %344 = arith.subf %62, %343 : vector<2x1xf32>
    %cst_77 = arith.constant 0.000000e+00 : f32
    %345 = vector.broadcast %cst_77 : f32 to vector<2x1xf32>
    %346 = arith.subf %345, %344 : vector<2x1xf32>
    %c0_78 = arith.constant 0 : index
    %c0_79 = arith.constant 0 : index
    %347 = vector.load %arg7[%c0_78, %c0_79] : memref<2x1xf32, #tpu.memory_space<vmem>>, vector<2x1xf32>
    tpu.vector_store %arg7[%c0_78, %c0_79], %346 {strides = array<i32>} : memref<2x1xf32, #tpu.memory_space<vmem>>, vector<2x1xf32>,
    %348 = vector.broadcast %12 : vector<1x6xf32> to vector<2x6xf32>
    %349 = arith.addf %332, %348 : vector<2x6xf32>
    %cst_80 = arith.constant dense<0xFF800000> : vector<2xf32>
    %350 = vector.multi_reduction <maximumf>, %349, %cst_80 [1] : vector<2x6xf32> to vector<2xf32>
    %351 = vector.shape_cast %350 : vector<2xf32> to vector<2x1xf32>
    %352 = vector.broadcast %351 : vector<2x1xf32> to vector<2x6xf32>
    %353 = arith.cmpf oeq, %349, %352 : vector<2x6xf32>
    %c6_i32_81 = arith.constant 6 : i32
    %354 = vector.broadcast %c6_i32_81 : i32 to vector<2x6xi32>
    %355 = arith.select %353, %6, %354 : vector<2x6xi1>, vector<2x6xi32>
    %cst_82 = arith.constant dense<2147483647> : vector<2xi32>
    %356 = vector.multi_reduction <minsi>, %355, %cst_82 [1] : vector<2x6xi32> to vector<2xi32>
    %357 = vector.shape_cast %356 : vector<2xi32> to vector<2x1xi32>
    %cst_83 = arith.constant 0.000000e+00 : f32
    %358 = vector.broadcast %cst_83 : f32 to vector<2x8xf32>
    %359 = vector.extract_strided_slice %2 {offsets = [0, 7], sizes = [2, 1], strides = [1, 1]} : vector<2x8xi32> to vector<2x1xi32>
    %c0_i32_84 = arith.constant 0 : i32
    %360 = vector.broadcast %c0_i32_84 : i32 to vector<2x1xi32>
    %361 = arith.cmpi sgt, %359, %360 : vector<2x1xi32>
    %c0_i32_85 = arith.constant 0 : i32
    %362 = vector.broadcast %c0_i32_85 : i32 to vector<2x1xi32>
    %363 = arith.select %361, %357, %362 : vector<2x1xi1>, vector<2x1xi32>
    %364 = arith.sitofp %363 : vector<2x1xi32> to vector<2x1xf32>
    %c7_i32 = arith.constant 7 : i32
    %365 = vector.broadcast %c7_i32 : i32 to vector<2x8xi32>
    %366 = arith.cmpi eq, %7, %365 : vector<2x8xi32>
    %367 = vector.shape_cast %364 : vector<2x1xf32> to vector<2x1xf32>
    %368 = vector.broadcast %367 : vector<2x1xf32> to vector<2x8xf32>
    %369 = arith.select %366, %368, %358 : vector<2x8xi1>, vector<2x8xf32>
    %c6_86 = arith.constant 6 : index
    %c0_87 = arith.constant 0 : index
    %c0_88 = arith.constant 0 : index
    %370 = vector.load %arg9[%c6_86, %c0_87, %c0_88] : memref<7x2x6xi32, #tpu.memory_space<vmem>>, vector<1x2x6xi32>
    %371 = vector.shape_cast %370 : vector<1x2x6xi32> to vector<2x6xi32>
    %372 = vector.broadcast %357 : vector<2x1xi32> to vector<2x6xi32>
    %373 = arith.cmpi eq, %6, %372 : vector<2x6xi32>
    %c0_i32_89 = arith.constant 0 : i32
    %374 = vector.broadcast %c0_i32_89 : i32 to vector<2x6xi32>
    %375 = arith.select %373, %371, %374 : vector<2x6xi1>, vector<2x6xi32>
    %cst_90 = arith.constant dense<0> : vector<2xi32>
    %376 = vector.multi_reduction <add>, %375, %cst_90 [1] : vector<2x6xi32> to vector<2xi32>
    %377 = vector.shape_cast %376 : vector<2xi32> to vector<2x1xi32>
    %378 = vector.extract_strided_slice %2 {offsets = [0, 6], sizes = [2, 1], strides = [1, 1]} : vector<2x8xi32> to vector<2x1xi32>
    %c0_i32_91 = arith.constant 0 : i32
    %379 = vector.broadcast %c0_i32_91 : i32 to vector<2x1xi32>
    %380 = arith.cmpi sgt, %378, %379 : vector<2x1xi32>
    %c0_i32_92 = arith.constant 0 : i32
    %381 = vector.broadcast %c0_i32_92 : i32 to vector<2x1xi32>
    %382 = arith.select %380, %377, %381 : vector<2x1xi1>, vector<2x1xi32>
    %383 = arith.sitofp %382 : vector<2x1xi32> to vector<2x1xf32>
    %c6_i32_93 = arith.constant 6 : i32
    %384 = vector.broadcast %c6_i32_93 : i32 to vector<2x8xi32>
    %385 = arith.cmpi eq, %7, %384 : vector<2x8xi32>
    %386 = vector.shape_cast %383 : vector<2x1xf32> to vector<2x1xf32>
    %387 = vector.broadcast %386 : vector<2x1xf32> to vector<2x8xf32>
    %388 = arith.select %385, %387, %369 : vector<2x8xi1>, vector<2x8xf32>
    %c5_94 = arith.constant 5 : index
    %c0_95 = arith.constant 0 : index
    %c0_96 = arith.constant 0 : index
    %389 = vector.load %arg9[%c5_94, %c0_95, %c0_96] : memref<7x2x6xi32, #tpu.memory_space<vmem>>, vector<1x2x6xi32>
    %390 = vector.shape_cast %389 : vector<1x2x6xi32> to vector<2x6xi32>
    %391 = vector.broadcast %377 : vector<2x1xi32> to vector<2x6xi32>
    %392 = arith.cmpi eq, %6, %391 : vector<2x6xi32>
    %c0_i32_97 = arith.constant 0 : i32
    %393 = vector.broadcast %c0_i32_97 : i32 to vector<2x6xi32>
    %394 = arith.select %392, %390, %393 : vector<2x6xi1>, vector<2x6xi32>
    %cst_98 = arith.constant dense<0> : vector<2xi32>
    %395 = vector.multi_reduction <add>, %394, %cst_98 [1] : vector<2x6xi32> to vector<2xi32>
    %396 = vector.shape_cast %395 : vector<2xi32> to vector<2x1xi32>
    %397 = vector.extract_strided_slice %2 {offsets = [0, 5], sizes = [2, 1], strides = [1, 1]} : vector<2x8xi32> to vector<2x1xi32>
    %c0_i32_99 = arith.constant 0 : i32
    %398 = vector.broadcast %c0_i32_99 : i32 to vector<2x1xi32>
    %399 = arith.cmpi sgt, %397, %398 : vector<2x1xi32>
    %c0_i32_100 = arith.constant 0 : i32
    %400 = vector.broadcast %c0_i32_100 : i32 to vector<2x1xi32>
    %401 = arith.select %399, %396, %400 : vector<2x1xi1>, vector<2x1xi32>
    %402 = arith.sitofp %401 : vector<2x1xi32> to vector<2x1xf32>
    %c5_i32 = arith.constant 5 : i32
    %403 = vector.broadcast %c5_i32 : i32 to vector<2x8xi32>
    %404 = arith.cmpi eq, %7, %403 : vector<2x8xi32>
    %405 = vector.shape_cast %402 : vector<2x1xf32> to vector<2x1xf32>
    %406 = vector.broadcast %405 : vector<2x1xf32> to vector<2x8xf32>
    %407 = arith.select %404, %406, %388 : vector<2x8xi1>, vector<2x8xf32>
    %c4_101 = arith.constant 4 : index
    %c0_102 = arith.constant 0 : index
    %c0_103 = arith.constant 0 : index
    %408 = vector.load %arg9[%c4_101, %c0_102, %c0_103] : memref<7x2x6xi32, #tpu.memory_space<vmem>>, vector<1x2x6xi32>
    %409 = vector.shape_cast %408 : vector<1x2x6xi32> to vector<2x6xi32>
    %410 = vector.broadcast %396 : vector<2x1xi32> to vector<2x6xi32>
    %411 = arith.cmpi eq, %6, %410 : vector<2x6xi32>
    %c0_i32_104 = arith.constant 0 : i32
    %412 = vector.broadcast %c0_i32_104 : i32 to vector<2x6xi32>
    %413 = arith.select %411, %409, %412 : vector<2x6xi1>, vector<2x6xi32>
    %cst_105 = arith.constant dense<0> : vector<2xi32>
    %414 = vector.multi_reduction <add>, %413, %cst_105 [1] : vector<2x6xi32> to vector<2xi32>
    %415 = vector.shape_cast %414 : vector<2xi32> to vector<2x1xi32>
    %416 = vector.extract_strided_slice %2 {offsets = [0, 4], sizes = [2, 1], strides = [1, 1]} : vector<2x8xi32> to vector<2x1xi32>
    %c0_i32_106 = arith.constant 0 : i32
    %417 = vector.broadcast %c0_i32_106 : i32 to vector<2x1xi32>
    %418 = arith.cmpi sgt, %416, %417 : vector<2x1xi32>
    %c0_i32_107 = arith.constant 0 : i32
    %419 = vector.broadcast %c0_i32_107 : i32 to vector<2x1xi32>
    %420 = arith.select %418, %415, %419 : vector<2x1xi1>, vector<2x1xi32>
    %421 = arith.sitofp %420 : vector<2x1xi32> to vector<2x1xf32>
    %c4_i32 = arith.constant 4 : i32
    %422 = vector.broadcast %c4_i32 : i32 to vector<2x8xi32>
    %423 = arith.cmpi eq, %7, %422 : vector<2x8xi32>
    %424 = vector.shape_cast %421 : vector<2x1xf32> to vector<2x1xf32>
    %425 = vector.broadcast %424 : vector<2x1xf32> to vector<2x8xf32>
    %426 = arith.select %423, %425, %407 : vector<2x8xi1>, vector<2x8xf32>
    %c3_108 = arith.constant 3 : index
    %c0_109 = arith.constant 0 : index
    %c0_110 = arith.constant 0 : index
    %427 = vector.load %arg9[%c3_108, %c0_109, %c0_110] : memref<7x2x6xi32, #tpu.memory_space<vmem>>, vector<1x2x6xi32>
    %428 = vector.shape_cast %427 : vector<1x2x6xi32> to vector<2x6xi32>
    %429 = vector.broadcast %415 : vector<2x1xi32> to vector<2x6xi32>
    %430 = arith.cmpi eq, %6, %429 : vector<2x6xi32>
    %c0_i32_111 = arith.constant 0 : i32
    %431 = vector.broadcast %c0_i32_111 : i32 to vector<2x6xi32>
    %432 = arith.select %430, %428, %431 : vector<2x6xi1>, vector<2x6xi32>
    %cst_112 = arith.constant dense<0> : vector<2xi32>
    %433 = vector.multi_reduction <add>, %432, %cst_112 [1] : vector<2x6xi32> to vector<2xi32>
    %434 = vector.shape_cast %433 : vector<2xi32> to vector<2x1xi32>
    %435 = vector.extract_strided_slice %2 {offsets = [0, 3], sizes = [2, 1], strides = [1, 1]} : vector<2x8xi32> to vector<2x1xi32>
    %c0_i32_113 = arith.constant 0 : i32
    %436 = vector.broadcast %c0_i32_113 : i32 to vector<2x1xi32>
    %437 = arith.cmpi sgt, %435, %436 : vector<2x1xi32>
    %c0_i32_114 = arith.constant 0 : i32
    %438 = vector.broadcast %c0_i32_114 : i32 to vector<2x1xi32>
    %439 = arith.select %437, %434, %438 : vector<2x1xi1>, vector<2x1xi32>
    %440 = arith.sitofp %439 : vector<2x1xi32> to vector<2x1xf32>
    %c3_i32 = arith.constant 3 : i32
    %441 = vector.broadcast %c3_i32 : i32 to vector<2x8xi32>
    %442 = arith.cmpi eq, %7, %441 : vector<2x8xi32>
    %443 = vector.shape_cast %440 : vector<2x1xf32> to vector<2x1xf32>
    %444 = vector.broadcast %443 : vector<2x1xf32> to vector<2x8xf32>
    %445 = arith.select %442, %444, %426 : vector<2x8xi1>, vector<2x8xf32>
    %c2_115 = arith.constant 2 : index
    %c0_116 = arith.constant 0 : index
    %c0_117 = arith.constant 0 : index
    %446 = vector.load %arg9[%c2_115, %c0_116, %c0_117] : memref<7x2x6xi32, #tpu.memory_space<vmem>>, vector<1x2x6xi32>
    %447 = vector.shape_cast %446 : vector<1x2x6xi32> to vector<2x6xi32>
    %448 = vector.broadcast %434 : vector<2x1xi32> to vector<2x6xi32>
    %449 = arith.cmpi eq, %6, %448 : vector<2x6xi32>
    %c0_i32_118 = arith.constant 0 : i32
    %450 = vector.broadcast %c0_i32_118 : i32 to vector<2x6xi32>
    %451 = arith.select %449, %447, %450 : vector<2x6xi1>, vector<2x6xi32>
    %cst_119 = arith.constant dense<0> : vector<2xi32>
    %452 = vector.multi_reduction <add>, %451, %cst_119 [1] : vector<2x6xi32> to vector<2xi32>
    %453 = vector.shape_cast %452 : vector<2xi32> to vector<2x1xi32>
    %454 = vector.extract_strided_slice %2 {offsets = [0, 2], sizes = [2, 1], strides = [1, 1]} : vector<2x8xi32> to vector<2x1xi32>
    %c0_i32_120 = arith.constant 0 : i32
    %455 = vector.broadcast %c0_i32_120 : i32 to vector<2x1xi32>
    %456 = arith.cmpi sgt, %454, %455 : vector<2x1xi32>
    %c0_i32_121 = arith.constant 0 : i32
    %457 = vector.broadcast %c0_i32_121 : i32 to vector<2x1xi32>
    %458 = arith.select %456, %453, %457 : vector<2x1xi1>, vector<2x1xi32>
    %459 = arith.sitofp %458 : vector<2x1xi32> to vector<2x1xf32>
    %c2_i32 = arith.constant 2 : i32
    %460 = vector.broadcast %c2_i32 : i32 to vector<2x8xi32>
    %461 = arith.cmpi eq, %7, %460 : vector<2x8xi32>
    %462 = vector.shape_cast %459 : vector<2x1xf32> to vector<2x1xf32>
    %463 = vector.broadcast %462 : vector<2x1xf32> to vector<2x8xf32>
    %464 = arith.select %461, %463, %445 : vector<2x8xi1>, vector<2x8xf32>
    %c1_122 = arith.constant 1 : index
    %c0_123 = arith.constant 0 : index
    %c0_124 = arith.constant 0 : index
    %465 = vector.load %arg9[%c1_122, %c0_123, %c0_124] : memref<7x2x6xi32, #tpu.memory_space<vmem>>, vector<1x2x6xi32>
    %466 = vector.shape_cast %465 : vector<1x2x6xi32> to vector<2x6xi32>
    %467 = vector.broadcast %453 : vector<2x1xi32> to vector<2x6xi32>
    %468 = arith.cmpi eq, %6, %467 : vector<2x6xi32>
    %c0_i32_125 = arith.constant 0 : i32
    %469 = vector.broadcast %c0_i32_125 : i32 to vector<2x6xi32>
    %470 = arith.select %468, %466, %469 : vector<2x6xi1>, vector<2x6xi32>
    %cst_126 = arith.constant dense<0> : vector<2xi32>
    %471 = vector.multi_reduction <add>, %470, %cst_126 [1] : vector<2x6xi32> to vector<2xi32>
    %472 = vector.shape_cast %471 : vector<2xi32> to vector<2x1xi32>
    %473 = vector.extract_strided_slice %2 {offsets = [0, 1], sizes = [2, 1], strides = [1, 1]} : vector<2x8xi32> to vector<2x1xi32>
    %c0_i32_127 = arith.constant 0 : i32
    %474 = vector.broadcast %c0_i32_127 : i32 to vector<2x1xi32>
    %475 = arith.cmpi sgt, %473, %474 : vector<2x1xi32>
    %c0_i32_128 = arith.constant 0 : i32
    %476 = vector.broadcast %c0_i32_128 : i32 to vector<2x1xi32>
    %477 = arith.select %475, %472, %476 : vector<2x1xi1>, vector<2x1xi32>
    %478 = arith.sitofp %477 : vector<2x1xi32> to vector<2x1xf32>
    %c1_i32_129 = arith.constant 1 : i32
    %479 = vector.broadcast %c1_i32_129 : i32 to vector<2x8xi32>
    %480 = arith.cmpi eq, %7, %479 : vector<2x8xi32>
    %481 = vector.shape_cast %478 : vector<2x1xf32> to vector<2x1xf32>
    %482 = vector.broadcast %481 : vector<2x1xf32> to vector<2x8xf32>
    %483 = arith.select %480, %482, %464 : vector<2x8xi1>, vector<2x8xf32>
    %c0_130 = arith.constant 0 : index
    %c0_131 = arith.constant 0 : index
    %c0_132 = arith.constant 0 : index
    %484 = vector.load %arg9[%c0_130, %c0_131, %c0_132] : memref<7x2x6xi32, #tpu.memory_space<vmem>>, vector<1x2x6xi32>
    %485 = vector.shape_cast %484 : vector<1x2x6xi32> to vector<2x6xi32>
    %486 = vector.broadcast %472 : vector<2x1xi32> to vector<2x6xi32>
    %487 = arith.cmpi eq, %6, %486 : vector<2x6xi32>
    %c0_i32_133 = arith.constant 0 : i32
    %488 = vector.broadcast %c0_i32_133 : i32 to vector<2x6xi32>
    %489 = arith.select %487, %485, %488 : vector<2x6xi1>, vector<2x6xi32>
    %cst_134 = arith.constant dense<0> : vector<2xi32>
    %490 = vector.multi_reduction <add>, %489, %cst_134 [1] : vector<2x6xi32> to vector<2xi32>
    %491 = vector.shape_cast %490 : vector<2xi32> to vector<2x1xi32>
    %c0_i32_135 = arith.constant 0 : i32
    %492 = vector.broadcast %c0_i32_135 : i32 to vector<2x8xi32>
    %493 = arith.cmpi eq, %7, %492 : vector<2x8xi32>
    %494 = arith.sitofp %491 : vector<2x1xi32> to vector<2x1xf32>
    %495 = vector.shape_cast %494 : vector<2x1xf32> to vector<2x1xf32>
    %496 = vector.broadcast %495 : vector<2x1xf32> to vector<2x8xf32>
    %497 = arith.select %493, %496, %483 : vector<2x8xi1>, vector<2x8xf32>
    %c0_136 = arith.constant 0 : index
    %c0_137 = arith.constant 0 : index
    %498 = vector.load %arg8[%c0_136, %c0_137] : memref<2x8xf32, #tpu.memory_space<vmem>>, vector<2x8xf32>
    tpu.vector_store %arg8[%c0_136, %c0_137], %497 {strides = array<i32>} : memref<2x8xf32, #tpu.memory_space<vmem>>, vector<2x8xf32>,
    return
  }
  func.func @transform_0(%arg0: i32) -> (i32, i32, i32) {
    %c0_i32 = arith.constant 0 : i32
    %c0_i32_0 = arith.constant 0 : i32
    %c0_i32_1 = arith.constant 0 : i32
    return %arg0, %c0_i32, %c0_i32_0 : i32, i32, i32
  }
  func.func @transform_1(%arg0: i32) -> (i32, i32) {
    %c0_i32 = arith.constant 0 : i32
    %c0_i32_0 = arith.constant 0 : i32
    return %arg0, %c0_i32 : i32, i32
  }
  func.func @transform_2(%arg0: i32) -> (i32, i32) {
    %c0_i32 = arith.constant 0 : i32
    %c0_i32_0 = arith.constant 0 : i32
    return %arg0, %c0_i32 : i32, i32
  }
  func.func @transform_3(%arg0: i32) -> (i32, i32) {
    %c0_i32 = arith.constant 0 : i32
    %c0_i32_0 = arith.constant 0 : i32
    %c0_i32_1 = arith.constant 0 : i32
    return %c0_i32, %c0_i32_0 : i32, i32
  }
  func.func @transform_4(%arg0: i32) -> (i32, i32) {
    %c0_i32 = arith.constant 0 : i32
    %c0_i32_0 = arith.constant 0 : i32
    %c0_i32_1 = arith.constant 0 : i32
    return %c0_i32, %c0_i32_0 : i32, i32
  }
  func.func @transform_5(%arg0: i32) -> (i32, i32) {
    %c0_i32 = arith.constant 0 : i32
    %c0_i32_0 = arith.constant 0 : i32
    %c0_i32_1 = arith.constant 0 : i32
    return %c0_i32, %c0_i32_0 : i32, i32
  }
  func.func @transform_6(%arg0: i32) -> (i32, i32) {
    %c0_i32 = arith.constant 0 : i32
    %c0_i32_0 = arith.constant 0 : i32
    return %arg0, %c0_i32 : i32, i32
  }
  func.func @transform_7(%arg0: i32) -> (i32, i32) {
    %c0_i32 = arith.constant 0 : i32
    %c0_i32_0 = arith.constant 0 : i32
    return %arg0, %c0_i32 : i32, i32
  }
}

</mosaic_0001>

<bundles_post_ra>
// kernel: tpu_custom_call.1
= control target key start
LH: loop header
LB: loop body
LE: loop exit
PB: predicated region body
PF: predicated region fallthrough
CT: control target
= control target key end

     0   :  { %v33_v1 = vlaneseq  ;;  %vm74_vm0 = vcmask 1041409   ;;  %s3224_s0 = inlined_call_operand.vmem [shape: f32[2,8,6], index: 0, kind: input, shape index: {}]   ;;  %s3225_s1 = inlined_call_operand.vmem [shape: s32[2,8], index: 1, kind: input, shape index: {}]   ;;  %s3226_s2 = inlined_call_operand.vmem [shape: s32[2,8], index: 2, kind: input, shape index: {}]   ;;  %s3227_s3 = inlined_call_operand.vmem [shape: f32[6,6], index: 3, kind: input, shape index: {}]   ;;  %s3228_s4 = inlined_call_operand.vmem [shape: f32[6,6], index: 4, kind: input, shape index: {}]   ;;  %s3229_s5 = inlined_call_operand.vmem [shape: f32[6,6], index: 5, kind: input, shape index: {}]   ;;  %s3230_s6 = inlined_call_operand.vmem [shape: f32[2,1], index: 6, kind: output, shape index: {0}]   ;;  %s3231_s7 = inlined_call_operand.hbm [shape: f32[2,8], index: 7, kind: output, shape index: {1}]  }
   0x1   :  { %v2460_v0 = vld [vmem:[%s3224_s0 + $0x8] sm:$0xff]  ;;  %v2466_v3 = vld [vmem:[%s3224_s0] sm:$0xff] }
   0x2   :  { %v351_v2 = vrot.slane %v2460_v0, 7  ;;  %v2468_v4 = vshrl.u32 %v33_v1, 7 }
   0x3   :  { %13 = vsyncpa [#allocation4], 0  ;;  %v30_v5 = vld [vmem:[%s3227_s3] sm:$0x3f]  ;;  %vm77_vm1 = vcmask 41984   ;;  %v2404_v14 = vmov 0.0  }
   0x4   :  { %v2474_v6 = vsub.s32 1, %v2468_v4  ;;  %v352_v7 = vsel %vm74_vm0, %v351_v2, %v2466_v3  ;;  %v2487_v11 = vsub.s32 0, %v2468_v4  ;;  %v28_v12 = vld [vmem:[%s3225_s1] sm:$0x3]  ;;  %2267 = vmatprep.subr.mxu0 %v2404_v14  ;;  %vm97_vm2 = vcmask 1045504   ;;  %2272 = vmatprep.subr.mxu1 %v2404_v14  ;;  %s2415_s17 = smov 127  }
   0x5   :  { %2268 = vmatpush3.msk.msra.mxu0 %vm97_vm2, %v30_v5  ;;  %vm2405_vm3 = vmmov 0   ;;  %2273 = vmatpush3.msk.msra.mxu1 %vm97_vm2, %v30_v5  ;;  %v2507_v16 = vld [vmem:[%s3226_s2] sm:$0x3]  ;;  %v3232_v17 = vmov 1   ;;  %v2407_v18 = vmov 0   ;;  %v2517_v21 = vand.u32 127, %v33_v1 }
   0x6   :  { %v2479_v8 = vrot.slane %v30_v5, %v2474_v6  ;;  %v39_v13 = vrot.slane %v28_v12, %v2487_v11  ;;  %2269 = vmatprep.mubr.msk.f32.mxu0 %vm2405_vm3, %v2404_v14  ;;  %2277 = vmatprep.subr.mxu0 %v2404_v14  ;;  %v46_v15 = vrot.slane %v28_v12, %v2474_v6  ;;  %vm355_vm4 = vcmp.gt.s32.totalorder %v2507_v16, 0  ;;  %v2524_v25 = vld [vmem:[%s3229_s5] sm:$0x3f] }
   0x7   :  { %2274 = vmatprep.mubr.msk.f32.mxu1 %vm2405_vm3, %v2404_v14  ;;  %2282 = vmatprep.subr.mxu1 %v2404_v14  ;;  %v2514_v19 = vsel %vm355_vm4, 1, %v2407_v18  ;;  %vm58_vm5 = vcmask 48128   ;;  %v2408_v30 = vmov 1966171168   ;;  %v2563_v37 = vld [vmem:[%s3228_s4] sm:$0x3f]  ;;  %v559_v40 = vrot.slane %v2460_v0, %v2474_v6 }
   0x8   :  { %v2482_v9 = vadd.f32 %v352_v7, %v2479_v8  ;;  %2325 = vset.pattern.permute.xlu1 %v3232_v17  ;;  %v465_v31 = vunpack.c.l.s4 %v2408_v30  ;;  %vm498_vm8 = vcmask 46080   ;;  %v552_v63 = vrot.slane %v2466_v3, %v2474_v6 }
   0x9   :  { %454 = vperm.xlu1 %2325, %v2514_v19   ;;  %v3233_v1 = vmov 2   ;;  %v2614_v30 = vsub.s32 %v2517_v21, %v2468_v4 }
   0xa   :  { %v356_v10 = vsel %vm77_vm1, %v2482_v9, -inf  ;;  %v466_v32 = vunpack.c.0.s8 %v465_v31 }
   0xb   :  { %357 = vmax.xlane.f32.xlu0 %v356_v10 }
   0xc   :  { %v2554_v33 = vsub.s32 %v466_v32, %v2468_v4 }
   0xd   :  { %2326 = vset.pattern.permute.xlu1 %v3233_v1 }
   0xe   :  { %v470_v34 = vrot.slane %v2482_v9, %v2554_v33 }
  0x10   :  { %v478_v35 = vrot.slane %v470_v34, %v2554_v33  ;;  %v471_v45 = vcombine.high %v470_v34, %v470_v34 }
  0x12   :  { %v489_v36 = vrot.slane %v478_v35, %v2487_v11  ;;  %v485_v49 = vrot.slane %v471_v45, %v2554_v33 }
  0x14   :  { %v2566_v38 = vadd.f32 %v489_v36, %v2563_v37  ;;  %v493_v55 = vrot.slane %v485_v49, %v2487_v11 }
  0x16   :  { %v499_v39 = vsel %vm498_vm8, %v2566_v38, -inf  ;;  %v2580_v59 = vadd.f32 %v493_v55, %v2563_v37 }
  0x18   :  { %v502_v62 = vsel %vm498_vm8, %v2580_v59, -inf }
  0x21   :  { %41 = vbcast.lane.b32.xlu0 %v39_v13, 256 }
  0x25   :  { %48 = vbcast.lane.b32.xlu0 %v46_v15, 256 }
  0x44   :  { %500 = vmax.xlane.f32.xlu0 %v499_v39 }
  0x5a   :  { %561 = vbcast.lane.b32.xlu0 %v559_v40, 256 }
  0x88   :  { %v455_v52 = vpop.permute.xlu1 %454 }
  0x89   :  { %vm456_vm9 = vcmp.eq.s32.totalorder %v455_v52, 1 }
  0x98   :  { %v358_v20 = vpop.xlane.xlu0 %357 }
  0x99   :  { %v359_v22 = vsub.f32 %v2482_v9, %v358_v20  ;;  %v439_v46 = vrot.slane %v358_v20, 7  ;;  %v443_v53 = vadd.f32 %v358_v20, %v2460_v0 }
  0x9b   :  { %v360_v23 = vmul.f32 1.442695, %v359_v22  ;;  %v442_v50 = vadd.f32 %v439_v46, %v2466_v3  ;;  %v2633_v46 = vsub.s32 2, %v2468_v4 }
  0x9c   :  { %v42_v24 = vpop.permute.xlu0 %41 }
  0x9d   :  { %2344 = vpow2.f32 %v360_v23  ;;  %vm50_vm6 = vcmp.eq.s32.totalorder %v2517_v21, %v42_v24 }
  0x9e   :  { %v2527_v26 = vsel %vm50_vm6, 1.0, %v2404_v14 }
  0x9f   :  { %2270 = vmatmul.mubr.msk.f32.vlgmr.msra.gmra.mrb[0].mxu0 %vm58_vm5, %v2527_v26 }
  0xa0   :  { %v49_v27 = vpop.permute.xlu0 %48  ;;  %2278 = vmatpush3.msk.msra.mxu0 %vm97_vm2, %v2524_v25  ;;  %2279 = vmatprep.mubr.msk.f32.mxu0 %vm2405_vm3, %v2404_v14 }
  0xa1   :  { %vm51_vm7 = vcmp.eq.s32.totalorder %v2517_v21, %v49_v27  ;;  %2287 = vmatprep.subr.mxu0 %v2404_v14 }
  0xa2   :  { %v2538_v28 = vsel %vm51_vm7, 1.0, %v2404_v14 }
  0xa3   :  { %2275 = vmatmul.mubr.msk.f32.vlgmr.msra.gmra.mrb[0].mxu1 %vm58_vm5, %v2538_v28 }
  0xa4   :  { %2283 = vmatpush3.msk.msra.mxu1 %vm97_vm2, %v2524_v25  ;;  %2284 = vmatprep.mubr.msk.f32.mxu1 %vm2405_vm3, %v2404_v14 }
  0xa5   :  { %2292 = vmatprep.subr.mxu1 %v2404_v14 }
  0xa7   :  { %v2345_v29 = vpop.eup %2344 }
  0xa8   :  { %2280 = vmatmul.mubr.msk.f32.vlgmr.msra.gmra.mrb[2].mxu0 %vm58_vm5, %v2345_v29 }
  0xa9   :  { %2288 = vmatpush3.msk.msra.mxu0 %vm97_vm2, %v2524_v25  ;;  %2289 = vmatprep.mubr.msk.f32.mxu0 %vm2405_vm3, %v2404_v14 }
  0xaa   :  { %2297 = vmatprep.subr.mxu0 %v2404_v14 }
  0xd1   :  { %v2598_v12 = vpop.xlane.xlu0 %500 }
  0xd5   :  { %v562_v22 = vpop.permute.xlu0 %561 }
 0x172   :  { %v2572_v41 = vpop.f32.mrb[0].mxu0 }
 0x173   :  { %v2271_v42 = vpop.f32.mrb[1].mxu0 }
 0x176   :  { %v2593_v2 = vpop.f32.mrb[0].mxu1 }
 0x177   :  { %v2276_v5 = vpop.f32.mrb[1].mxu1 }
 0x17b   :  { %v434_v43 = vpop.f32.mrb[2].mxu0 }
 0x17c   :  { %2346 = vlog2.f32 %v434_v43  ;;  %v2281_v44 = vpop.f32.mrb[3].mxu0 }
 0x186   :  { %v2347_v47 = vpop.eup %2346 }
 0x187   :  { %v445_v48 = vmul.f32 0.6931472, %v2347_v47 }
 0x189   :  { %v447_v51 = vrot.slane %v445_v48, 7  ;;  %v451_v56 = vadd.f32 %v445_v48, %v443_v53 }
 0x18b   :  { %v450_v54 = vadd.f32 %v447_v51, %v442_v50 }
 0x18d   :  { %v459_v57 = vrot.slane %v450_v54, 1 }
 0x18f   :  { %v460_v58 = vsel %vm74_vm0, %v451_v56, %v459_v57 }
 0x190   :  { %v2584_v60 = vsel %vm456_vm9, %v460_v58, %v2482_v9 }
 0x191   :  { %v586_v61 = vsel %vm77_vm1, %v2584_v60, -inf }
 0x192   :  { %587 = vmax.xlane.f32.xlu1 %v586_v61 }
 0x196   :  { %503 = vmax.xlane.f32.xlu1 %v502_v62 }
 0x1a7   :  { %554 = vbcast.lane.b32.xlu1 %v552_v63, 256 }
 0x1ab   :  { %682 = vperm.xlu1 %2326, %v2514_v19  }
 0x1af   :  { %2327 = vset.pattern.permute.xlu1 %v2407_v18 }
 0x21f   :  { %v588_v7 = vpop.xlane.xlu1 %587 }
 0x220   :  { %v589_v10 = vsub.f32 %v2584_v60, %v588_v7  ;;  %v666_v49 = vrot.slane %v588_v7, 6  ;;  %v667_v50 = vrot.slane %v588_v7, 7 }
 0x222   :  { %v590_v13 = vmul.f32 1.442695, %v589_v10  ;;  %v670_v54 = vadd.f32 %v666_v49, %v2466_v3  ;;  %v671_v55 = vadd.f32 %v667_v50, %v2460_v0 }
 0x223   :  { %v2600_v15 = vpop.xlane.xlu1 %503 }
 0x224   :  { %2348 = vpow2.f32 %v590_v13  ;;  %v566_v24 = vadd.f32 %v562_v22, %v2600_v15 }
 0x227   :  { %v555_v20 = vpop.permute.xlu1 %554 }
 0x228   :  { %v565_v23 = vadd.f32 %v555_v20, %v2598_v12 }
 0x22a   :  { %570 = vperm.xlu1 %2327, %v565_v23  }
 0x22b   :  { %v2610_v29 = vpop.permute.xlu1 %682 }
 0x22c   :  { %vm684_vm10 = vcmp.eq.s32.totalorder %v2610_v29, 1 }
 0x22e   :  { %v2349_v27 = vpop.eup %2348  ;;  %573 = vperm.xlu1 %2327, %v566_v24   ;;  %v781_v24 = vrot.slane %v2466_v3, %v2633_v46 }
 0x22f   :  { %2285 = vmatmul.mubr.msk.f32.vlgmr.msra.gmra.mrb[2].mxu1 %vm58_vm5, %v2349_v27 }
 0x230   :  { %2293 = vmatpush3.msk.msra.mxu1 %vm97_vm2, %v2524_v25  ;;  %2294 = vmatprep.mubr.msk.f32.mxu1 %vm2405_vm3, %v2404_v14 }
 0x231   :  { %2302 = vmatprep.subr.mxu1 %v2404_v14 }
 0x2a9   :  { %v571_v31 = vpop.permute.xlu1 %570 }
 0x2aa   :  { %v578_v32 = vrot.slane %v571_v31, %v2614_v30 }
 0x2ad   :  { %v574_v34 = vpop.permute.xlu1 %573 }
 0x2ae   :  { %v582_v35 = vrot.slane %v574_v34, %v2614_v30 }
 0x2b0   :  { %v583_v36 = vsel %vm74_vm0, %v582_v35, %v578_v32 }
 0x2b1   :  { %v2621_v39 = vsel %vm456_vm9, %v583_v36, %v2482_v9  ;;  %v788_v9 = vrot.slane %v2460_v0, %v2633_v46 }
 0x2b2   :  { %v699_v40 = vrot.slane %v2621_v39, %v2554_v33 }
 0x2b4   :  { %v707_v42 = vrot.slane %v699_v40, %v2554_v33  ;;  %v700_v51 = vcombine.high %v699_v40, %v699_v40 }
 0x2b6   :  { %v718_v43 = vrot.slane %v707_v42, %v2487_v11  ;;  %v714_v58 = vrot.slane %v700_v51, %v2554_v33 }
 0x2b8   :  { %v2628_v44 = vadd.f32 %v718_v43, %v2563_v37  ;;  %v722_v10 = vrot.slane %v714_v58, %v2487_v11 }
 0x2ba   :  { %v727_v45 = vsel %vm498_vm8, %v2628_v44, -inf  ;;  %v2651_v22 = vadd.f32 %v722_v10, %v2563_v37 }
 0x2bb   :  { %728 = vmax.xlane.f32.xlu0 %v727_v45  ;;  %v3235_v45 = vmov 3  }
 0x2bc   :  { %v730_v23 = vsel %vm498_vm8, %v2651_v22, -inf  ;;  %2328 = vset.pattern.permute.xlu0 %v3235_v45 }
 0x2d1   :  { %790 = vbcast.lane.b32.xlu0 %v788_v9, 256 }
 0x302   :  { %v661_v47 = vpop.f32.mrb[2].mxu1 }
 0x303   :  { %2350 = vlog2.f32 %v661_v47  ;;  %v2286_v48 = vpop.f32.mrb[3].mxu1 }
 0x30d   :  { %v2351_v52 = vpop.eup %2350 }
 0x30e   :  { %v673_v53 = vmul.f32 0.6931472, %v2351_v52 }
 0x310   :  { %v675_v56 = vrot.slane %v673_v53, 6  ;;  %v676_v57 = vrot.slane %v673_v53, 7 }
 0x312   :  { %v679_v61 = vadd.f32 %v675_v56, %v670_v54  ;;  %v680_v62 = vadd.f32 %v676_v57, %v671_v55 }
 0x314   :  { %v687_v63 = vrot.slane %v679_v61, 2  ;;  %v688_v5 = vrot.slane %v680_v62, 1  ;;  %v1009_v62 = vsub.s32 3, %v2468_v4 }
 0x316   :  { %v689_v7 = vsel %vm74_vm0, %v688_v5, %v687_v63  ;;  %v1017_v63 = vrot.slane %v2460_v0, %v1009_v62  ;;  %v1010_v5 = vrot.slane %v2466_v3, %v1009_v62 }
 0x317   :  { %v2646_v13 = vsel %vm684_vm10, %v689_v7, %v2584_v60 }
 0x318   :  { %v815_v20 = vsel %vm77_vm1, %v2646_v13, -inf }
 0x319   :  { %816 = vmax.xlane.f32.xlu1 %v815_v20 }
 0x31d   :  { %731 = vmax.xlane.f32.xlu1 %v730_v23 }
 0x32e   :  { %783 = vbcast.lane.b32.xlu1 %v781_v24, 256 }
 0x348   :  { %v2660_v34 = vpop.xlane.xlu0 %728 }
 0x34c   :  { %v791_v40 = vpop.permute.xlu0 %790 }
 0x3a6   :  { %v817_v27 = vpop.xlane.xlu1 %816 }
 0x3a7   :  { %v818_v31 = vsub.f32 %v2646_v13, %v817_v27  ;;  %v895_v24 = vrot.slane %v817_v27, 5 }
 0x3a9   :  { %v819_v60 = vmul.f32 1.442695, %v818_v31  ;;  %v896_v31 = vrot.slane %v817_v27, 6 }
 0x3aa   :  { %v2658_v32 = vpop.xlane.xlu1 %731 }
 0x3ab   :  { %2352 = vpow2.f32 %v819_v60  ;;  %v795_v42 = vadd.f32 %v791_v40, %v2658_v32 }
 0x3ae   :  { %v784_v35 = vpop.permute.xlu1 %783 }
 0x3af   :  { %v794_v36 = vadd.f32 %v784_v35, %v2660_v34 }
 0x3b1   :  { %799 = vperm.xlu1 %2327, %v794_v36  }
 0x3b5   :  { %v2353_v43 = vpop.eup %2352  ;;  %802 = vperm.xlu1 %2327, %v795_v42   ;;  %v899_v42 = vadd.f32 %v895_v24, %v2466_v3 }
 0x3b6   :  { %2290 = vmatmul.mubr.msk.f32.vlgmr.msra.gmra.mrb[4].mxu0 %vm58_vm5, %v2353_v43  ;;  %v900_v43 = vadd.f32 %v896_v31, %v2460_v0 }
 0x3b7   :  { %2298 = vmatpush3.msk.msra.mxu0 %vm97_vm2, %v2524_v25  ;;  %2299 = vmatprep.mubr.msk.f32.mxu0 %vm2405_vm3, %v2404_v14 }
 0x3b8   :  { %2307 = vmatprep.subr.mxu0 %v2404_v14 }
 0x430   :  { %v800_v9 = vpop.permute.xlu1 %799 }
 0x431   :  { %v807_v48 = vrot.slane %v800_v9, %v2614_v30 }
 0x434   :  { %v803_v47 = vpop.permute.xlu1 %802 }
 0x435   :  { %v811_v49 = vrot.slane %v803_v47, %v2614_v30 }
 0x437   :  { %v812_v50 = vsel %vm74_vm0, %v811_v49, %v807_v48 }
 0x438   :  { %v814_v51 = vsel %vm684_vm10, %v812_v50, %v2621_v39 }
 0x439   :  { %v928_v52 = vrot.slane %v814_v51, %v2554_v33 }
 0x43b   :  { %v936_v53 = vrot.slane %v928_v52, %v2554_v33  ;;  %v929_v54 = vcombine.high %v928_v52, %v928_v52 }
 0x43d   :  { %v947_v55 = vrot.slane %v936_v53, %v2487_v11  ;;  %v943_v56 = vrot.slane %v929_v54, %v2554_v33 }
 0x43f   :  { %v2682_v57 = vadd.f32 %v947_v55, %v2563_v37  ;;  %v951_v58 = vrot.slane %v943_v56, %v2487_v11 }
 0x441   :  { %v956_v61 = vsel %vm498_vm8, %v2682_v57, -inf  ;;  %v2688_v29 = vadd.f32 %v951_v58, %v2563_v37 }
 0x442   :  { %957 = vmax.xlane.f32.xlu0 %v956_v61 }
 0x443   :  { %v959_v39 = vsel %vm498_vm8, %v2688_v29, -inf }
 0x444   :  { %960 = vmax.xlane.f32.xlu1 %v959_v39 }
 0x455   :  { %1019 = vbcast.lane.b32.xlu1 %v1017_v63, 256 }
 0x458   :  { %1012 = vbcast.lane.b32.xlu0 %v1010_v5, 256 }
 0x45c   :  { %911 = vperm.xlu0 %2328, %v2514_v19  }
 0x460   :  { %2329 = vset.pattern.permute.xlu0 %v2407_v18 }
 0x489   :  { %v890_v10 = vpop.f32.mrb[4].mxu0 }
 0x48a   :  { %v2291_v7 = vpop.f32.mrb[5].mxu0  ;;  %2354 = vlog2.f32 %v890_v10 }
 0x494   :  { %v2355_v20 = vpop.eup %2354 }
 0x495   :  { %v902_v23 = vmul.f32 0.6931472, %v2355_v20 }
 0x497   :  { %v904_v35 = vrot.slane %v902_v23, 5  ;;  %v905_v36 = vrot.slane %v902_v23, 6 }
 0x499   :  { %v908_v47 = vadd.f32 %v904_v35, %v899_v42  ;;  %v909_v48 = vadd.f32 %v905_v36, %v900_v43 }
 0x49b   :  { %v916_v52 = vrot.slane %v908_v47, 3  ;;  %v917_v53 = vrot.slane %v909_v48, 2  ;;  %v1238_v48 = vsub.s32 4, %v2468_v4 }
 0x49d   :  { %v918_v55 = vsel %vm74_vm0, %v917_v53, %v916_v52  ;;  %v1239_v52 = vrot.slane %v2466_v3, %v1238_v48 }
 0x4cf   :  { %v2697_v60 = vpop.xlane.xlu0 %957 }
 0x4d1   :  { %v2699_v40 = vpop.xlane.xlu1 %960 }
 0x4d3   :  { %v1013_v9 = vpop.permute.xlu0 %1012 }
 0x4d4   :  { %v1023_v49 = vadd.f32 %v1013_v9, %v2697_v60 }
 0x4d5   :  { %v1020_v50 = vpop.permute.xlu1 %1019 }
 0x4d6   :  { %1028 = vperm.xlu1 %2327, %v1023_v49   ;;  %v1024_v27 = vadd.f32 %v1020_v50, %v2699_v40  ;;  %v1246_v49 = vrot.slane %v2460_v0, %v1238_v48 }
 0x4da   :  { %1031 = vperm.xlu1 %2327, %v1024_v27  }
 0x4db   :  { %v912_v54 = vpop.permute.xlu0 %911 }
 0x4dc   :  { %vm913_vm11 = vcmp.eq.s32.totalorder %v912_v54, 1 }
 0x4dd   :  { %v2707_v56 = vsel %vm913_vm11, %v918_v55, %v2646_v13 }
 0x4de   :  { %v1044_v58 = vsel %vm77_vm1, %v2707_v56, -inf }
 0x4df   :  { %1045 = vmax.xlane.f32.xlu0 %v1044_v58 }
 0x555   :  { %v1029_v61 = vpop.permute.xlu1 %1028 }
 0x556   :  { %v1036_v62 = vrot.slane %v1029_v61, %v2614_v30 }
 0x559   :  { %v1032_v39 = vpop.permute.xlu1 %1031 }
 0x55a   :  { %v1040_v63 = vrot.slane %v1032_v39, %v2614_v30  ;;  %v3234_v39 = vmov 4  }
 0x55c   :  { %v1041_v5 = vsel %vm74_vm0, %v1040_v63, %v1036_v62 }
 0x55d   :  { %v1043_v10 = vsel %vm913_vm11, %v1041_v5, %v814_v51 }
 0x55e   :  { %v1157_v7 = vrot.slane %v1043_v10, %v2554_v33 }
 0x560   :  { %v1165_v20 = vrot.slane %v1157_v7, %v2554_v33  ;;  %v1158_v23 = vcombine.high %v1157_v7, %v1157_v7 }
 0x562   :  { %v1176_v13 = vrot.slane %v1165_v20, %v2487_v11  ;;  %v1172_v24 = vrot.slane %v1158_v23, %v2554_v33 }
 0x564   :  { %v2719_v31 = vadd.f32 %v1176_v13, %v2563_v37  ;;  %v1180_v35 = vrot.slane %v1172_v24, %v2487_v11 }
 0x566   :  { %v1185_v36 = vsel %vm498_vm8, %v2719_v31, -inf  ;;  %v2725_v42 = vadd.f32 %v1180_v35, %v2563_v37 }
 0x567   :  { %1186 = vmax.xlane.f32.xlu1 %v1185_v36 }
 0x568   :  { %v1188_v51 = vsel %vm498_vm8, %v2725_v42, -inf }
 0x569   :  { %1189 = vmax.xlane.f32.xlu0 %v1188_v51 }
 0x56c   :  { %v1046_v43 = vpop.xlane.xlu0 %1045 }
 0x56d   :  { %v1047_v9 = vsub.f32 %v2707_v56, %v1046_v43  ;;  %v1124_v20 = vrot.slane %v1046_v43, 4  ;;  %v1125_v23 = vrot.slane %v1046_v43, 5 }
 0x56f   :  { %v1048_v47 = vmul.f32 1.442695, %v1047_v9  ;;  %v1128_v35 = vadd.f32 %v1124_v20, %v2466_v3  ;;  %v1129_v36 = vadd.f32 %v1125_v23, %v2460_v0 }
 0x571   :  { %2356 = vpow2.f32 %v1048_v47 }
 0x578   :  { %1248 = vbcast.lane.b32.xlu1 %v1246_v49, 256 }
 0x57b   :  { %v2357_v50 = vpop.eup %2356 }
 0x57c   :  { %2295 = vmatmul.mubr.msk.f32.vlgmr.msra.gmra.mrb[4].mxu1 %vm58_vm5, %v2357_v50 }
 0x57d   :  { %2303 = vmatpush3.msk.msra.mxu1 %vm97_vm2, %v2524_v25  ;;  %2304 = vmatprep.mubr.msk.f32.mxu1 %vm2405_vm3, %v2404_v14 }
 0x57f   :  { %1241 = vbcast.lane.b32.xlu0 %v1239_v52, 256 }
 0x5f4   :  { %v2738_v53 = vpop.xlane.xlu1 %1186 }
 0x5f6   :  { %v2740_v27 = vpop.xlane.xlu0 %1189 }
 0x5f8   :  { %v1249_v54 = vpop.permute.xlu1 %1248 }
 0x5f9   :  { %v1253_v55 = vadd.f32 %v1249_v54, %v2740_v27 }
 0x5fa   :  { %v1242_v58 = vpop.permute.xlu0 %1241 }
 0x5fb   :  { %v1252_v61 = vadd.f32 %v1242_v58, %v2738_v53  ;;  %1260 = vperm.xlu0 %2329, %v1253_v55  }
 0x5fd   :  { %1257 = vperm.xlu1 %2327, %v1252_v61  }
 0x601   :  { %2330 = vset.pattern.permute.xlu1 %v3234_v39 }
 0x602   :  { %1140 = vperm.xlu1 %2330, %v2514_v19  }
 0x606   :  { %2331 = vset.pattern.permute.xlu1 %v2407_v18 }
 0x64f   :  { %v1119_v62 = vpop.f32.mrb[4].mxu1 }
 0x650   :  { %v2296_v63 = vpop.f32.mrb[5].mxu1  ;;  %2358 = vlog2.f32 %v1119_v62 }
 0x65a   :  { %v2359_v5 = vpop.eup %2358 }
 0x65b   :  { %v1131_v7 = vmul.f32 0.6931472, %v2359_v5 }
 0x65d   :  { %v1133_v13 = vrot.slane %v1131_v7, 4  ;;  %v1134_v24 = vrot.slane %v1131_v7, 5 }
 0x65f   :  { %v1137_v51 = vadd.f32 %v1133_v13, %v1128_v35  ;;  %v1138_v9 = vadd.f32 %v1134_v24, %v1129_v36  ;;  %v1467_v36 = vsub.s32 5, %v2468_v4 }
 0x661   :  { %v1145_v49 = vrot.slane %v1137_v51, 4  ;;  %v1146_v50 = vrot.slane %v1138_v9, 3  ;;  %v1475_v51 = vrot.slane %v2460_v0, %v1467_v36  ;;  %v1468_v9 = vrot.slane %v2466_v3, %v1467_v36 }
 0x663   :  { %v1147_v58 = vsel %vm74_vm0, %v1146_v50, %v1145_v49 }
 0x67a   :  { %v1261_v48 = vpop.permute.xlu0 %1260 }
 0x67b   :  { %v1269_v54 = vrot.slane %v1261_v48, %v2614_v30 }
 0x67c   :  { %v1258_v47 = vpop.permute.xlu1 %1257 }
 0x67d   :  { %v1265_v52 = vrot.slane %v1258_v47, %v2614_v30 }
 0x67f   :  { %v1270_v43 = vsel %vm74_vm0, %v1269_v54, %v1265_v52 }
 0x681   :  { %v1141_v55 = vpop.permute.xlu1 %1140 }
 0x682   :  { %vm1142_vm12 = vcmp.eq.s32.totalorder %v1141_v55, 1  ;;  %v2412_v55 = vmov 5  }
 0x683   :  { %v1272_v61 = vsel %vm1142_vm12, %v1270_v43, %v1043_v10  ;;  %v2754_v62 = vsel %vm1142_vm12, %v1147_v58, %v2707_v56 }
 0x684   :  { %v1386_v63 = vrot.slane %v1272_v61, %v2554_v33  ;;  %v1273_v43 = vsel %vm77_vm1, %v2754_v62, -inf }
 0x686   :  { %v1387_v5 = vcombine.high %v1386_v63, %v1386_v63  ;;  %v1394_v7 = vrot.slane %v1386_v63, %v2554_v33 }
 0x688   :  { %v1405_v20 = vrot.slane %v1394_v7, %v2487_v11  ;;  %v1401_v23 = vrot.slane %v1387_v5, %v2554_v33 }
 0x68a   :  { %v2761_v13 = vadd.f32 %v1405_v20, %v2563_v37  ;;  %v1409_v24 = vrot.slane %v1401_v23, %v2487_v11 }
 0x68c   :  { %v1414_v10 = vsel %vm498_vm8, %v2761_v13, -inf  ;;  %v2767_v56 = vadd.f32 %v1409_v24, %v2563_v37 }
 0x68d   :  { %1415 = vmax.xlane.f32.xlu1 %v1414_v10 }
 0x68e   :  { %v1417_v35 = vsel %vm498_vm8, %v2767_v56, -inf }
 0x68f   :  { %1418 = vmax.xlane.f32.xlu0 %v1417_v35 }
 0x69e   :  { %1477 = vbcast.lane.b32.xlu1 %v1475_v51, 256 }
 0x6a5   :  { %1470 = vbcast.lane.b32.xlu0 %v1468_v9, 256 }
 0x71a   :  { %v2774_v47 = vpop.xlane.xlu1 %1415 }
 0x71b   :  { %vm1420_vm12 = vcmp.eq.f32.partialorder %v2761_v13, %v2774_v47 }
 0x71c   :  { %v2776_v48 = vpop.xlane.xlu0 %1418 }
 0x71e   :  { %v1478_v49 = vpop.permute.xlu1 %1477 }
 0x71f   :  { %v1482_v50 = vadd.f32 %v1478_v49, %v2776_v48 }
 0x720   :  { %v1471_v52 = vpop.permute.xlu0 %1470 }
 0x721   :  { %v1481_v54 = vadd.f32 %v1471_v52, %v2774_v47  ;;  %1489 = vperm.xlu0 %2329, %v1482_v50  }
 0x723   :  { %1486 = vperm.xlu1 %2331, %v1481_v54  }
 0x727   :  { %2332 = vset.pattern.permute.xlu1 %v2412_v55 }
 0x728   :  { %1369 = vperm.xlu1 %2332, %v2514_v19  }
 0x72c   :  { %2333 = vset.pattern.permute.xlu1 %v2407_v18 }
 0x740   :  { %1274 = vmax.xlane.f32.xlu0 %v1273_v43  ;;  %v1696_v43 = vsub.s32 6, %v2468_v4 }
 0x7a0   :  { %v1490_v63 = vpop.permute.xlu0 %1489 }
 0x7a1   :  { %v1498_v7 = vrot.slane %v1490_v63, %v2614_v30  ;;  %v1697_v63 = vrot.slane %v2466_v3, %v1696_v43 }
 0x7a2   :  { %v1487_v58 = vpop.permute.xlu1 %1486 }
 0x7a3   :  { %v1494_v5 = vrot.slane %v1487_v58, %v2614_v30  ;;  %v1704_v58 = vrot.slane %v2460_v0, %v1696_v43 }
 0x7a5   :  { %v1499_v23 = vsel %vm74_vm0, %v1498_v7, %v1494_v5 }
 0x7a7   :  { %v2787_v20 = vpop.permute.xlu1 %1369 }
 0x7a8   :  { %vm1371_vm13 = vcmp.eq.s32.totalorder %v2787_v20, 1 }
 0x7a9   :  { %v1501_v24 = vsel %vm1371_vm13, %v1499_v23, %v1272_v61 }
 0x7aa   :  { %v1615_v10 = vrot.slane %v1501_v24, %v2554_v33 }
 0x7ac   :  { %v1616_v35 = vcombine.high %v1615_v10, %v1615_v10  ;;  %v1623_v36 = vrot.slane %v1615_v10, %v2554_v33 }
 0x7ae   :  { %v1634_v51 = vrot.slane %v1623_v36, %v2487_v11  ;;  %v1630_v9 = vrot.slane %v1616_v35, %v2554_v33 }
 0x7b0   :  { %v2798_v49 = vadd.f32 %v1634_v51, %v2563_v37  ;;  %v1638_v50 = vrot.slane %v1630_v9, %v2487_v11 }
 0x7b2   :  { %v1643_v52 = vsel %vm498_vm8, %v2798_v49, -inf  ;;  %v2804_v54 = vadd.f32 %v1638_v50, %v2563_v37 }
 0x7b3   :  { %1644 = vmax.xlane.f32.xlu1 %v1643_v52 }
 0x7b4   :  { %v1646_v61 = vsel %vm498_vm8, %v2804_v54, -inf }
 0x7b5   :  { %1647 = vmax.xlane.f32.xlu0 %v1646_v61  ;;  %v2413_v61 = vmov 6  }
 0x7c4   :  { %1706 = vbcast.lane.b32.xlu1 %v1704_v58, 256 }
 0x7cb   :  { %1699 = vbcast.lane.b32.xlu0 %v1697_v63, 256 }
 0x7cd   :  { %v2811_v5 = vpop.xlane.xlu0 %1274 }
 0x7ce   :  { %v1276_v7 = vsub.f32 %v2754_v62, %v2811_v5 }
 0x7d0   :  { %v1277_v23 = vmul.f32 1.442695, %v1276_v7 }
 0x7d2   :  { %2360 = vpow2.f32 %v1277_v23 }
 0x7dc   :  { %v2361_v10 = vpop.eup %2360 }
 0x7dd   :  { %2300 = vmatmul.mubr.msk.f32.vlgmr.msra.gmra.mrb[6].mxu0 %vm58_vm5, %v2361_v10 }
 0x7de   :  { %2308 = vmatpush3.msk.msra.mxu0 %vm97_vm2, %v2524_v25  ;;  %2309 = vmatprep.mubr.msk.f32.mxu0 %vm2405_vm3, %v2404_v14 }
 0x840   :  { %v2820_v35 = vpop.xlane.xlu1 %1644 }
 0x841   :  { %vm1649_vm7 = vcmp.eq.f32.partialorder %v2798_v49, %v2820_v35 }
 0x842   :  { %v2822_v36 = vpop.xlane.xlu0 %1647 }
 0x843   :  { %vm1650_vm11 = vcmp.eq.f32.partialorder %v2804_v54, %v2822_v36 }
 0x844   :  { %v1707_v51 = vpop.permute.xlu1 %1706 }
 0x845   :  { %v1711_v9 = vadd.f32 %v1707_v51, %v2822_v36 }
 0x846   :  { %v1700_v50 = vpop.permute.xlu0 %1699 }
 0x847   :  { %v1710_v52 = vadd.f32 %v1700_v50, %v2820_v35  ;;  %1718 = vperm.xlu0 %2329, %v1711_v9  }
 0x849   :  { %1715 = vperm.xlu1 %2333, %v1710_v52  }
 0x84d   :  { %2334 = vset.pattern.permute.xlu1 %v2413_v61 }
 0x84e   :  { %1598 = vperm.xlu1 %2334, %v2514_v19  }
 0x852   :  { %2335 = vset.pattern.permute.xlu1 %v2407_v18 }
 0x8b0   :  { %v1348_v25 = vpop.f32.mrb[6].mxu0 }
 0x8b1   :  { %v2301_v43 = vpop.f32.mrb[7].mxu0  ;;  %2362 = vlog2.f32 %v1348_v25 }
 0x8c6   :  { %v1719_v63 = vpop.permute.xlu0 %1718 }
 0x8c7   :  { %v1727_v23 = vrot.slane %v1719_v63, %v2614_v30 }
 0x8c8   :  { %v1716_v58 = vpop.permute.xlu1 %1715 }
 0x8c9   :  { %v1723_v7 = vrot.slane %v1716_v58, %v2614_v30 }
 0x8cb   :  { %v1728_v51 = vsel %vm74_vm0, %v1727_v23, %v1723_v7 }
 0x8cd   :  { %v2830_v10 = vpop.permute.xlu1 %1598 }
 0x8ce   :  { %vm1600_vm14 = vcmp.eq.s32.totalorder %v2830_v10, 1 }
 0x8cf   :  { %v2836_v9 = vsel %vm1600_vm14, %v1728_v51, %v1501_v24  ;;  %v1925_v51 = vsub.s32 7, %v2468_v4  ;;  %v2363_v4 = vpop.eup %2362 }
 0x8d0   :  { %v1844_v18 = vrot.slane %v2836_v9, %v2554_v33 }
 0x8d2   :  { %v1845_v50 = vcombine.high %v1844_v18, %v1844_v18  ;;  %v1852_v52 = vrot.slane %v1844_v18, %v2554_v33  ;;  %v1933_v18 = vrot.slane %v2460_v0, %v1925_v51 }
 0x8d4   :  { %v1863_v43 = vrot.slane %v1852_v52, %v2487_v11  ;;  %v1859_v58 = vrot.slane %v1845_v50, %v2554_v33  ;;  %v1926_v52 = vrot.slane %v2466_v3, %v1925_v51  ;;  %v1354_v51 = vrot.slane %v2811_v5, 4 }
 0x8d6   :  { %v1870_v63 = vadd.f32 %v1863_v43, %v2563_v37  ;;  %v1867_v17 = vrot.slane %v1859_v58, %v2487_v11 }
 0x8d8   :  { %v1872_v7 = vsel %vm498_vm8, %v1870_v63, -inf  ;;  %v1871_v23 = vadd.f32 %v1867_v17, %v2563_v37  ;;  %v2414_v17 = vmov 7  }
 0x8d9   :  { %1873 = vmax.xlane.f32.xlu0 %v1872_v7  ;;  %v1360_v7 = vmul.f32 0.6931472, %v2363_v4 }
 0x8da   :  { %v1875_v24 = vsel %vm498_vm8, %v1871_v23, -inf }
 0x8db   :  { %1876 = vmax.xlane.f32.xlu1 %v1875_v24  ;;  %v1353_v24 = vrot.slane %v2811_v5, 3 }
 0x8ec   :  { %1935 = vbcast.lane.b32.xlu1 %v1933_v18, 256  ;;  %v1362_v18 = vrot.slane %v1360_v7, 3 }
 0x8ef   :  { %1928 = vbcast.lane.b32.xlu0 %v1926_v52, 256  ;;  %v1363_v52 = vrot.slane %v1360_v7, 4 }
 0x966   :  { %v1874_v33 = vpop.xlane.xlu0 %1873 }
 0x967   :  { %vm1878_vm15 = vcmp.eq.f32.partialorder %v1870_v63, %v1874_v33 }
 0x968   :  { %v1877_v50 = vpop.xlane.xlu1 %1876 }
 0x969   :  { %vm1879_vm2 = vcmp.eq.f32.partialorder %v1871_v23, %v1877_v50 }
 0x96a   :  { %v1929_v43 = vpop.permute.xlu0 %1928 }
 0x96b   :  { %v1939_v58 = vadd.f32 %v1929_v43, %v1874_v33  ;;  %v1357_v43 = vadd.f32 %v1353_v24, %v2466_v3  ;;  %v1881_v24 = vsel %vm1879_vm2, %v2517_v21, 6  ;;  %vm1421_vm2 = vcmp.eq.f32.partialorder %v2767_v56, %v2776_v48 }
 0x96c   :  { %v1936_v1 = vpop.permute.xlu1 %1935  ;;  %v1897_v23 = vsel %vm498_vm8, %v1881_v24, 2147483647  ;;  %v70_v48 = vmul.f32 %v2538_v28, %v2479_v8 }
 0x96d   :  { %v1940_v39 = vadd.f32 %v1936_v1, %v1877_v50  ;;  %1944 = vperm.xlu0 %2329, %v1939_v58   ;;  %v1358_v1 = vadd.f32 %v1354_v51, %v2460_v0  ;;  %v1366_v25 = vadd.f32 %v1362_v18, %v1357_v43  ;;  %v1899_v43 = vshra.s32 %v1897_v23, 16 }
 0x96f   :  { %1947 = vperm.xlu1 %2335, %v1940_v39   ;;  %v1367_v39 = vadd.f32 %v1363_v52, %v1358_v1  ;;  %v1374_v58 = vrot.slane %v1366_v25, 5 }
 0x971   :  { %2336 = vset.pattern.permute.xlu0 %v2414_v17  ;;  %v1375_v45 = vrot.slane %v1367_v39, 4 }
 0x972   :  { %1827 = vperm.xlu0 %2336, %v2514_v19   ;;  %v1880_v19 = vsel %vm1878_vm15, %v2517_v21, 6 }
 0x973   :  { %2337 = vset.pattern.permute.xlu1 %v2414_v17  ;;  %v1882_v17 = vsel %vm498_vm8, %v1880_v19, 2147483647 }
 0x974   :  { %v1884_v4 = vshra.s32 %v1882_v17, 16  ;;  %v1883_v25 = vand.u32 65535, %v1882_v17 }
 0x976   :  { %2338 = vset.pattern.permute.xlu0 %v2413_v61  ;;  %v1376_v61 = vsel %vm74_vm0, %v1375_v45, %v1374_v58  ;;  %v1886_v7 = vcvt.s32.f32 %v1884_v4 }
 0x977   :  { %v2862_v5 = vsel %vm1371_vm13, %v1376_v61, %v2754_v62  ;;  %v2871_v62 = vrot.slane %v2563_v37, %v2633_v46  ;;  %v1901_v37 = vcvt.s32.f32 %v1899_v43  ;;  %v1885_v61 = vcvt.s32.f32 %v1883_v25 }
 0x978   :  { %v1502_v0 = vsel %vm77_vm1, %v2862_v5, -inf }
 0x993   :  { %1503 = vmax.xlane.f32.xlu1 %v1502_v0 }
 0x997   :  { %1887 = vmin.xlane.f32.xlu1 %v1886_v7 }
 0x9ec   :  { %v1945_v63 = vpop.permute.xlu0 %1944 }
 0x9ed   :  { %v1952_v45 = vrot.slane %v1945_v63, %v2614_v30 }
 0x9ee   :  { %v1948_v33 = vpop.permute.xlu1 %1947 }
 0x9ef   :  { %v1956_v51 = vrot.slane %v1948_v33, %v2614_v30  ;;  %v1651_v33 = vsel %vm1649_vm7, %v2517_v21, 6 }
 0x9f1   :  { %v2873_v20 = vpop.permute.xlu0 %1827  ;;  %v1957_v18 = vsel %vm74_vm0, %v1956_v51, %v1952_v45  ;;  %v1898_v51 = vand.u32 65535, %v1897_v23 }
 0x9f2   :  { %vm1829_vm3 = vcmp.eq.s32.totalorder %v2873_v20, 1 }
 0x9f3   :  { %v1959_v50 = vsel %vm1829_vm3, %v1957_v18, %v2836_v9  ;;  %v1653_v18 = vsel %vm498_vm8, %v1651_v33, 2147483647 }
 0x9f4   :  { %v1995_v52 = vadd.f32 %v1959_v50, %v2871_v62  ;;  %v1900_v50 = vcvt.s32.f32 %v1898_v51  ;;  %v1655_v43 = vshra.s32 %v1653_v18, 16 }
 0x9f6   :  { %v1996_v1 = vsel %vm77_vm1, %v1995_v52, -inf  ;;  %v1657_v49 = vcvt.s32.f32 %v1655_v43 }
 0x9f7   :  { %1997 = vmax.xlane.f32.xlu0 %v1996_v1 }
 0x9fb   :  { %1902 = vmin.xlane.f32.xlu0 %v1901_v37 }
 0xa20   :  { %v1504_v46 = vpop.xlane.xlu1 %1503 }
 0xa21   :  { %v1505_v39 = vsub.f32 %v2862_v5, %v1504_v46  ;;  %v1582_v25 = vrot.slane %v1504_v46, 2 }
 0xa23   :  { %v1506_v58 = vmul.f32 1.442695, %v1505_v39  ;;  %v1583_v39 = vrot.slane %v1504_v46, 3  ;;  %v1586_v23 = vadd.f32 %v1582_v25, %v2466_v3  ;;  %v1652_v46 = vsel %vm1650_vm11, %v2517_v21, 6 }
 0xa24   :  { %v1888_v19 = vpop.xlane.xlu1 %1887  ;;  %v1668_v54 = vsel %vm498_vm8, %v1652_v46, 2147483647  ;;  %vm295_vm11 = vcmask 58368  }
 0xa25   :  { %2364 = vpow2.f32 %v1506_v58  ;;  %vm1889_vm6 = vcmp.eq.f32.partialorder %v1886_v7, %v1888_v19  ;;  %v1894_v36 = vcvt.f32.s32 %v1888_v19 }
 0xa26   :  { %v1890_v4 = vsel %vm1889_vm6, %v1885_v61, inf }
 0xa27   :  { %1891 = vmin.xlane.f32.xlu0 %v1890_v4 }
 0xa2f   :  { %v2365_v9 = vpop.eup %2364 }
 0xa30   :  { %2305 = vmatmul.mubr.msk.f32.vlgmr.msra.gmra.mrb[6].mxu1 %vm58_vm5, %v2365_v9 }
 0xa84   :  { %v1998_v0 = vpop.xlane.xlu0 %1997 }
 0xa85   :  { %vm1999_vm9 = vcmp.eq.f32.partialorder %v1995_v52, %v1998_v0 }
 0xa86   :  { %v2000_v63 = vsel %vm1999_vm9, %v2517_v21, 6  ;;  %vm252_vm9 = vcmask 48129  }
 0xa87   :  { %v2001_v17 = vsel %vm77_vm1, %v2000_v63, 2147483647 }
 0xa88   :  { %v2003_v24 = vshra.s32 %v2001_v17, 16  ;;  %v1903_v45 = vpop.xlane.xlu0 %1902 }
 0xa89   :  { %vm1904_vm10 = vcmp.eq.f32.partialorder %v1901_v37, %v1903_v45  ;;  %v2897_v37 = vld [vmem:[%s3224_s0 + $0x8] sm:$0xff] }
 0xa8a   :  { %v2005_v7 = vcvt.s32.f32 %v2003_v24  ;;  %v1905_v1 = vsel %vm1904_vm10, %v1900_v50, inf  ;;  %v1587_v4 = vadd.f32 %v2897_v37, %v1583_v39  ;;  %v2002_v50 = vand.u32 65535, %v2001_v17 }
 0xa8b   :  { %v1670_v39 = vshra.s32 %v1668_v54, 16  ;;  %v1422_v17 = vsel %vm1420_vm12, %v2517_v21, 6  ;;  %vm278_vm12 = vcmask 50176  }
 0xa8c   :  { %2006 = vmin.xlane.f32.xlu1 %v2005_v7 }
 0xa8d   :  { %v1672_v19 = vcvt.s32.f32 %v1670_v39  ;;  %v1423_v39 = vsel %vm1421_vm2, %v2517_v21, 6  ;;  %vm1191_vm2 = vcmp.eq.f32.partialorder %v2719_v31, %v2738_v53 }
 0xa8e   :  { %v2931_v56 = vsel %vm498_vm8, %v1423_v39, 2147483647 }
 0xa90   :  { %1906 = vmin.xlane.f32.xlu1 %v1905_v1 }
 0xa94   :  { %1658 = vmin.xlane.f32.xlu1 %v1657_v49 }
 0xab4   :  { %v1892_v43 = vpop.xlane.xlu0 %1891 }
 0xab5   :  { %v1893_v25 = vcvt.f32.s32 %v1892_v43 }
 0xb03   :  { %v1577_v35 = vpop.f32.mrb[6].mxu1 }
 0xb04   :  { %2366 = vlog2.f32 %v1577_v35  ;;  %v2306_v52 = vpop.f32.mrb[7].mxu1  ;;  %v2004_v35 = vcvt.s32.f32 %v2002_v50 }
 0xb05   :  { %v1909_v52 = vcvt.f32.s32 %v1903_v45 }
 0xb0e   :  { %v2367_v58 = vpop.eup %2366 }
 0xb0f   :  { %v1589_v61 = vmul.f32 0.6931472, %v2367_v58 }
 0xb11   :  { %v1591_v9 = vrot.slane %v1589_v61, 2  ;;  %v1592_v0 = vrot.slane %v1589_v61, 3  ;;  %v1895_v61 = vshll.u32 %v1894_v36, 16 }
 0xb13   :  { %v1595_v63 = vadd.f32 %v1591_v9, %v1586_v23  ;;  %v1596_v33 = vadd.f32 %v1592_v0, %v1587_v4  ;;  %v1654_v4 = vand.u32 65535, %v1653_v18  ;;  %v1910_v9 = vshll.u32 %v1909_v52, 16 }
 0xb14   :  { %v1896_v0 = vadd.s32 %v1895_v61, %v1893_v25 }
 0xb15   :  { %v1603_v24 = vrot.slane %v1595_v63, 6  ;;  %v1604_v51 = vrot.slane %v1596_v33, 5  ;;  %v2909_v33 = vsel %vm498_vm8, %v1422_v17, 2147483647  ;;  %v1656_v45 = vcvt.s32.f32 %v1654_v4 }
 0xb16   :  { %v1426_v18 = vshra.s32 %v2909_v33, 16 }
 0xb17   :  { %v2903_v3 = vsel %vm74_vm0, %v1604_v51, %v1603_v24 }
 0xb18   :  { %v2919_v50 = vcvt.s32.f32 %v1426_v18  ;;  %v3018_v31 = vsel %vm1600_vm14, %v2903_v3, %v2862_v5  ;;  %vm733_vm14 = vcmp.eq.f32.partialorder %v2628_v44, %v2660_v34 }
 0xb19   :  { %v2007_v1 = vpop.xlane.xlu1 %2006  ;;  %v1731_v53 = vsel %vm77_vm1, %v3018_v31, -inf }
 0xb1a   :  { %vm2008_vm13 = vcmp.eq.f32.partialorder %v2005_v7, %v2007_v1  ;;  %v1915_v7 = vrot.slane %v1896_v0, %v2614_v30  ;;  %v2013_v43 = vcvt.f32.s32 %v2007_v1 }
 0xb1b   :  { %v2009_v58 = vsel %vm2008_vm13, %v2004_v35, inf  ;;  %v1669_v35 = vand.u32 65535, %v1668_v54 }
 0xb1c   :  { %2010 = vmin.xlane.f32.xlu0 %v2009_v58  ;;  %v2014_v52 = vshll.u32 %v2013_v43, 16 }
 0xb1d   :  { %v1907_v23 = vpop.xlane.xlu1 %1906  ;;  %v1671_v61 = vcvt.s32.f32 %v1669_v35 }
 0xb1e   :  { %v1908_v63 = vcvt.f32.s32 %v1907_v23 }
 0xb20   :  { %v1911_v13 = vadd.s32 %v1910_v9, %v1908_v63  ;;  %1673 = vmin.xlane.f32.xlu0 %v1672_v19 }
 0xb21   :  { %v2911_v47 = vpop.xlane.xlu1 %1658 }
 0xb22   :  { %v1919_v46 = vrot.slane %v1911_v13, %v2614_v30  ;;  %vm1660_vm15 = vcmp.eq.f32.partialorder %v1657_v49, %v2911_v47  ;;  %v1441_v13 = vshra.s32 %v2931_v56, 16 }
 0xb23   :  { %v1661_v24 = vsel %vm1660_vm15, %v1656_v45, inf }
 0xb24   :  { %v1920_v51 = vsel %vm74_vm0, %v1919_v46, %v1915_v7  ;;  %1662 = vmin.xlane.f32.xlu1 %v1661_v24  ;;  %v69_v7 = vmul.f32 %v2527_v26, %v2479_v8  ;;  %v73_v46 = vrot.slane %v70_v48, 7  ;;  %v2945_v18 = vcvt.s32.f32 %v1441_v13 }
 0xb25   :  { %1922 = vst.msk [vmem:[#allocation2 + $0xc] sm:$0x3] %vm77_vm1, %v1920_v51  ;;  %v246_v24 = vrot.slane %v2572_v41, 7  ;;  %v247_v51 = vrot.slane %v2593_v2, 7 }
 0xb26   :  { %v75_v35 = vsel %vm74_vm0, %v73_v46, %v69_v7 }
 0xb27   :  { %v78_v8 = vsel %vm77_vm1, %v75_v35, 0.0  ;;  %v251_v41 = vmul.f32 %v2538_v28, %v247_v51 }
 0xb28   :  { %1429 = vmin.xlane.f32.xlu1 %v2919_v50 }
 0xb29   :  { %v256_v39 = vsel %vm252_vm9, %v251_v41, 0.0 }
 0xb2c   :  { %v2025_v17 = vld [vmem:[#allocation2 + $0xc] sm:$0x3] }
 0xba9   :  { %v2011_v36 = vpop.xlane.xlu0 %2010 }
 0xbaa   :  { %v2012_v49 = vcvt.f32.s32 %v2011_v36  ;;  %v57_v36 = vmul.f32 %v2897_v37, %v2538_v28 }
 0xbac   :  { %v2924_v25 = vadd.s32 %v2014_v52, %v2012_v49  ;;  %v62_v52 = vsel %vm58_vm5, %v57_v36, 0.0  ;;  %v250_v49 = vmul.f32 %v2527_v26, %v246_v24 }
 0xbad   :  { %v1674_v58 = vpop.xlane.xlu0 %1673 }
 0xbae   :  { %vm2026_vm6 = vcmp.eq.s32.totalorder %v2517_v21, %v2924_v25  ;;  %vm1675_vm7 = vcmp.eq.f32.partialorder %v1672_v19, %v1674_v58  ;;  %v2939_v19 = vld [vmem:[%s3224_s0] sm:$0xff]  ;;  %v253_v2 = vsel %vm252_vm9, %v250_v49, 0.0  ;;  %vm505_vm9 = vcmp.eq.f32.partialorder %v2566_v38, %v2598_v12 }
 0xbaf   :  { %v1676_v23 = vsel %vm1675_vm7, %v1671_v61, inf  ;;  %v2027_v1 = vsel %vm2026_vm6, %v2025_v17, 0  ;;  %v56_v45 = vmul.f32 %v2939_v19, %v2527_v26  ;;  %v1665_v17 = vcvt.f32.s32 %v2911_v47 }
 0xbb0   :  { %1677 = vmin.xlane.f32.xlu0 %v1676_v23  ;;  %v2028_v54 = vsel %vm77_vm1, %v2027_v1, 0  ;;  %v1680_v23 = vcvt.f32.s32 %v1674_v58  ;;  %vm1192_vm7 = vcmp.eq.f32.partialorder %v2725_v42, %v2740_v27  ;;  %v507_v27 = vsel %vm505_vm9, %v2517_v21, 6 }
 0xbb1   :  { %v2029_v4 = vand.u32 65535, %v2028_v54  ;;  %v2030_v9 = vshrl.u32 %v2028_v54, 16  ;;  %v59_v43 = vsel %vm58_vm5, %v56_v45, 0.0  ;;  %v1663_v61 = vpop.xlane.xlu1 %1662  ;;  %v1666_v54 = vshll.u32 %v1665_v17, 16 }
 0xbb2   :  { %v1664_v1 = vcvt.f32.s32 %v1663_v61  ;;  %v509_v3 = vsel %vm498_vm8, %v507_v27, 2147483647 }
 0xbb3   :  { %v2031_v0 = vcvt.s32.f32 %v2029_v4  ;;  %v2032_v63 = vcvt.s32.f32 %v2030_v9  ;;  %v1681_v4 = vshll.u32 %v1680_v23, 16 }
 0xbb4   :  { %v1667_v9 = vadd.s32 %v1666_v54, %v1664_v1  ;;  %v2378_v1 = vld [vmem:[%s3226_s2] sm:$0x3] }
 0xbb5   :  { %2033 = vadd.xlane.f32.xlu0 %v2031_v0  ;;  %2035 = vadd.xlane.f32.xlu1 %v2032_v63  ;;  %v2959_v0 = vpop.xlane.xlu1 %1429  ;;  %v35_v54 = vcvt.s32.f32 %v2378_v1 }
 0xbb6   :  { %v1686_v63 = vrot.slane %v1667_v9, %v2614_v30  ;;  %vm1431_vm15 = vcmp.eq.f32.partialorder %v2919_v50, %v2959_v0 }
 0xbb9   :  { %1444 = vmin.xlane.f32.xlu0 %v2945_v18  ;;  %60 = vadd.xlane.f32.xlu1 %v59_v43 }
 0xbbd   :  { %63 = vadd.xlane.f32.xlu0 %v62_v52  ;;  %79 = vadd.xlane.f32.xlu1 %v78_v8 }
 0xbc1   :  { %254 = vadd.xlane.f32.xlu0 %v253_v2  ;;  %257 = vadd.xlane.f32.xlu1 %v256_v39 }
 0xc3d   :  { %v1678_v48 = vpop.xlane.xlu0 %1677 }
 0xc3e   :  { %v1679_v26 = vcvt.f32.s32 %v1678_v48 }
 0xc40   :  { %v1682_v28 = vadd.s32 %v1681_v4, %v1679_v26 }
 0xc42   :  { %v1690_v13 = vrot.slane %v1682_v28, %v2614_v30  ;;  %v2034_v45 = vpop.xlane.xlu0 %2033  ;;  %v2036_v7 = vpop.xlane.xlu1 %2035  ;;  %v1440_v28 = vand.u32 65535, %v2931_v56 }
 0xc43   :  { %v2038_v46 = vcvt.f32.s32 %v2036_v7  ;;  %v2037_v47 = vcvt.f32.s32 %v2034_v45  ;;  %v296_v45 = vsel %vm295_vm11, %v2378_v1, 0 }
 0xc44   :  { %v1691_v24 = vsel %vm74_vm0, %v1690_v13, %v1686_v63  ;;  %v1442_v63 = vcvt.s32.f32 %v1440_v28  ;;  %v297_v7 = vand.u32 65535, %v296_v45 }
 0xc45   :  { %1693 = vst.msk [vmem:[#allocation2 + $0xa] sm:$0x3] %vm77_vm1, %v1691_v24  ;;  %v2039_v58 = vshll.u32 %v2038_v46, 16 }
 0xc46   :  { %v2965_v51 = vpop.xlane.xlu0 %1444  ;;  %v61_v43 = vpop.xlane.xlu1 %60 }
 0xc47   :  { %v2967_v36 = vadd.s32 %v2039_v58, %v2037_v47  ;;  %vm1446_vm10 = vcmp.eq.f32.partialorder %v2945_v18, %v2965_v51  ;;  %v299_v47 = vcvt.s32.f32 %v297_v7  ;;  %v298_v58 = vshrl.u32 %v296_v45, 16 }
 0xc48   :  { %v1447_v13 = vsel %vm1446_vm10, %v1442_v63, inf  ;;  %vm506_vm10 = vcmp.eq.f32.partialorder %v2580_v59, %v2600_v15 }
 0xc49   :  { %v508_v38 = vsel %vm506_vm10, %v2517_v21, 6 }
 0xc4a   :  { %v64_v35 = vpop.xlane.xlu0 %63  ;;  %v80_v52 = vpop.xlane.xlu1 %79 }
 0xc4b   :  { %v85_v8 = vrot.slane %v80_v52, %v2487_v11  ;;  %v89_v49 = vrot.slane %v80_v52, %v2474_v6 }
 0xc4d   :  { %v92_v41 = vadd.f32 %v85_v8, %v61_v43  ;;  %v93_v2 = vadd.f32 %v89_v49, %v64_v35 }
 0xc4e   :  { %v255_v39 = vpop.xlane.xlu0 %254  ;;  %v258_v61 = vpop.xlane.xlu1 %257 }
 0xc4f   :  { %v259_v17 = vadd.f32 %v255_v39, %v61_v43  ;;  %v260_v23 = vadd.f32 %v258_v61, %v64_v35  ;;  %v300_v43 = vcvt.s32.f32 %v298_v58 }
 0xc51   :  { %v266_v48 = vrot.slane %v259_v17, %v2614_v30  ;;  %v270_v4 = vrot.slane %v260_v23, %v2614_v30 }
 0xc53   :  { %v271_v9 = vsel %vm74_vm0, %v270_v4, %v266_v48  ;;  %v2379_v48 = vld [vmem:[%s3225_s1] sm:$0x3] }
 0xc54   :  { %v273_v26 = vmul.f32 %v271_v9, %v35_v54 }
 0xc56   :  { %275 = vrot.lane.b32.xlu0 %v273_v26, %s2415_s17 }
 0xc75   :  { %1448 = vmin.xlane.f32.xlu0 %v1447_v13 }
 0xcc8   :  { %v276_v46 = vpop.permute.xlu0 %275 }
 0xcc9   :  { %v279_v24 = vsel %vm278_vm12, %v276_v46, 0.0  ;;  %v1451_v46 = vcvt.f32.s32 %v2965_v51  ;;  %vm734_vm12 = vcmp.eq.f32.partialorder %v2651_v22, %v2658_v32 }
 0xcca   :  { %280 = vadd.xlane.f32.xlu1 %v279_v24  ;;  %v736_v44 = vsel %vm734_vm12, %v2517_v21, 6 }
 0xcce   :  { %301 = vadd.xlane.f32.xlu1 %v299_v47  ;;  %v1436_v47 = vcvt.f32.s32 %v2959_v0 }
 0xcd2   :  { %303 = vadd.xlane.f32.xlu1 %v300_v43  ;;  %v1452_v43 = vshll.u32 %v1451_v46, 16 }
 0xd02   :  { %v1449_v7 = vpop.xlane.xlu0 %1448 }
 0xd03   :  { %v1450_v58 = vcvt.f32.s32 %v1449_v7  ;;  %v3054_v7 = vsel %vm498_vm8, %v736_v44, 2147483647 }
 0xd04   :  { %v754_v46 = vshra.s32 %v3054_v7, 16 }
 0xd57   :  { %v281_v56 = vpop.xlane.xlu1 %280 }
 0xd58   :  { %v286_v35 = vrot.slane %v281_v56, %v2487_v11  ;;  %v290_v18 = vrot.slane %v281_v56, %v2474_v6  ;;  %v1437_v56 = vshll.u32 %v1436_v47, 16 }
 0xd5a   :  { %v2983_v52 = vadd.f32 %v286_v35, %v92_v41  ;;  %v2985_v8 = vadd.f32 %v290_v18, %v93_v2  ;;  %v1425_v2 = vand.u32 65535, %v2909_v33  ;;  %v1453_v35 = vadd.s32 %v1452_v43, %v1450_v58 }
 0xd5b   :  { %v302_v49 = vpop.xlane.xlu1 %301 }
 0xd5c   :  { %v305_v17 = vcvt.f32.s32 %v302_v49  ;;  %v1427_v28 = vcvt.s32.f32 %v1425_v2  ;;  %v1194_v2 = vsel %vm1192_vm7, %v2517_v21, 6 }
 0xd5d   :  { %v3024_v42 = vsel %vm498_vm8, %v1194_v2, 2147483647 }
 0xd5e   :  { %v1432_v13 = vsel %vm1431_vm15, %v1427_v28, inf  ;;  %v1212_v5 = vshra.s32 %v3024_v42, 16  ;;  %v3039_v28 = vsel %vm498_vm8, %v508_v38, 2147483647  ;;  %vm963_vm15 = vcmp.eq.f32.partialorder %v2688_v29, %v2699_v40 }
 0xd5f   :  { %v304_v39 = vpop.xlane.xlu1 %303  ;;  %v526_v15 = vshra.s32 %v3039_v28, 16 }
 0xd60   :  { %v306_v61 = vcvt.f32.s32 %v304_v39  ;;  %v1461_v39 = vrot.slane %v1453_v35, %v2614_v30  ;;  %v3036_v12 = vcvt.s32.f32 %v1212_v5 }
 0xd61   :  { %v528_v34 = vcvt.s32.f32 %v526_v15 }
 0xd62   :  { %v307_v23 = vshll.u32 %v306_v61, 16 }
 0xd64   :  { %v308_v1 = vadd.s32 %v307_v23, %v305_v17 }
 0xd66   :  { %v2219_v54 = vadd.s32 4294967295, %v308_v1 }
 0xd68   :  { %vm310_vm13 = vcmp.eq.s32.totalorder %v2517_v21, %v2219_v54  ;;  %v1193_v54 = vsel %vm1191_vm2, %v2517_v21, 6 }
 0xd69   :  { %v311_v4 = vsel %vm310_vm13, %v2379_v48, 0  ;;  %vm962_vm13 = vcmp.eq.f32.partialorder %v2682_v57, %v2697_v60  ;;  %v965_v57 = vsel %vm963_vm15, %v2517_v21, 6  ;;  %v756_v60 = vcvt.s32.f32 %v754_v46 }
 0xd6a   :  { %v312_v9 = vsel %vm295_vm11, %v311_v4, 0  ;;  %v964_v22 = vsel %vm962_vm13, %v2517_v21, 6  ;;  %v3066_v58 = vsel %vm498_vm8, %v965_v57, 2147483647  ;;  %vm1993_vm15 = vcmask 1024  }
 0xd6b   :  { %v313_v41 = vand.u32 65535, %v312_v9  ;;  %v314_v63 = vshrl.u32 %v312_v9, 16  ;;  %v983_v29 = vshra.s32 %v3066_v58, 16 }
 0xd6d   :  { %v315_v26 = vcvt.s32.f32 %v313_v41  ;;  %v316_v45 = vcvt.s32.f32 %v314_v63  ;;  %v3011_v41 = vsel %vm498_vm8, %v1193_v54, 2147483647  ;;  %v735_v63 = vsel %vm733_vm14, %v2517_v21, 6 }
 0xd6e   :  { %v3072_v40 = vcvt.s32.f32 %v983_v29 }
 0xd6f   :  { %317 = vadd.xlane.f32.xlu1 %v315_v26  ;;  %v511_v26 = vshra.s32 %v509_v3, 16 }
 0xd71   :  { %v513_v59 = vcvt.s32.f32 %v511_v26 }
 0xd73   :  { %1433 = vmin.xlane.f32.xlu1 %v1432_v13  ;;  %v3047_v13 = vsel %vm498_vm8, %v735_v63, 2147483647 }
 0xd77   :  { %319 = vadd.xlane.f32.xlu1 %v316_v45  ;;  %v739_v45 = vshra.s32 %v3047_v13, 16 }
 0xd79   :  { %v741_v32 = vcvt.s32.f32 %v739_v45 }
 0xdfc   :  { %v318_v24 = vpop.xlane.xlu1 %317 }
 0xdfd   :  { %v321_v23 = vcvt.f32.s32 %v318_v24  ;;  %v3061_v24 = vsel %vm498_vm8, %v964_v22, 2147483647  ;;  %vm2051_vm8 = vcmp.eq.s32.totalorder %v2517_v21, %v2967_v36 }
 0xdfe   :  { %v968_v47 = vshra.s32 %v3061_v24, 16  ;;  %v967_v46 = vand.u32 65535, %v3061_v24 }
 0xe00   :  { %v1434_v33 = vpop.xlane.xlu1 %1433  ;;  %v3068_v43 = vcvt.s32.f32 %v968_v47  ;;  %v969_v47 = vcvt.s32.f32 %v967_v46 }
 0xe01   :  { %v1435_v18 = vcvt.f32.s32 %v1434_v33  ;;  %v2050_v33 = vld [vmem:[#allocation2 + $0xa] sm:$0x3] }
 0xe03   :  { %v1438_v49 = vadd.s32 %v1437_v56, %v1435_v18 }
 0xe04   :  { %v320_v50 = vpop.xlane.xlu1 %319 }
 0xe05   :  { %v1457_v61 = vrot.slane %v1438_v49, %v2614_v30  ;;  %v322_v17 = vcvt.f32.s32 %v320_v50  ;;  %v2052_v49 = vsel %vm2051_vm8, %v2050_v33, 0  ;;  %vm2018_vm8 = vcmp.eq.s32.totalorder %v2517_v21, 7 }
 0xe07   :  { %v1462_v1 = vsel %vm74_vm0, %v1461_v39, %v1457_v61  ;;  %v323_v51 = vshll.u32 %v322_v17, 16  ;;  %v1196_v17 = vand.u32 65535, %v3011_v41 }
 0xe08   :  { %1464 = vst.msk [vmem:[#allocation2 + $0x8] sm:$0x3] %vm77_vm1, %v1462_v1  ;;  %v2053_v1 = vsel %vm77_vm1, %v2052_v49, 0 }
 0xe09   :  { %v324_v0 = vadd.s32 %v323_v51, %v321_v23  ;;  %v1198_v54 = vcvt.s32.f32 %v1196_v17 }
 0xe0b   :  { %vm325_vm6 = vcmp.eq.s32.totalorder %v2517_v21, %v324_v0 }
 0xe0c   :  { %v2220_v48 = vsel %vm325_vm6, 1.0, %v2404_v14  ;;  %v1197_v14 = vshra.s32 %v3011_v41, 16  ;;  %v2054_v41 = vand.u32 65535, %v2053_v1 }
 0xe0d   :  { %v332_v4 = vmul.f32 %v2220_v48, %v2871_v62 }
 0xe0e   :  { %v1199_v10 = vcvt.s32.f32 %v1197_v14  ;;  %v2056_v27 = vcvt.s32.f32 %v2054_v41 }
 0xe0f   :  { %v333_v9 = vsel %vm77_vm1, %v332_v4, 0.0  ;;  %v510_v4 = vand.u32 65535, %v509_v3  ;;  %v738_v3 = vand.u32 65535, %v3047_v13 }
 0xe10   :  { %334 = vadd.xlane.f32.xlu1 %v333_v9 }
 0xe11   :  { %v512_v14 = vcvt.s32.f32 %v510_v4  ;;  %v740_v44 = vcvt.s32.f32 %v738_v3  ;;  %v2075_v4 = vld [vmem:[#allocation2 + $0x8] sm:$0x3] }
 0xe14   :  { %1732 = vmax.xlane.f32.xlu1 %v1731_v53  ;;  %v525_v53 = vand.u32 65535, %v3039_v28  ;;  %v753_v28 = vand.u32 65535, %v3054_v7  ;;  %v982_v7 = vand.u32 65535, %v3066_v58 }
 0xe16   :  { %v527_v26 = vcvt.s32.f32 %v525_v53  ;;  %v755_v22 = vcvt.s32.f32 %v753_v28 }
 0xe18   :  { %1200 = vmin.xlane.f32.xlu1 %v1199_v10 }
 0xe1c   :  { %1215 = vmin.xlane.f32.xlu1 %v3036_v12 }
 0xe20   :  { %514 = vmin.xlane.f32.xlu1 %v513_v59 }
 0xe24   :  { %529 = vmin.xlane.f32.xlu1 %v528_v34 }
 0xe28   :  { %742 = vmin.xlane.f32.xlu1 %v741_v32 }
 0xe2c   :  { %757 = vmin.xlane.f32.xlu1 %v756_v60 }
 0xe30   :  { %971 = vmin.xlane.f32.xlu1 %v3068_v43 }
 0xe34   :  { %986 = vmin.xlane.f32.xlu1 %v3072_v40 }
 0xe9d   :  { %v335_v56 = vpop.xlane.xlu1 %334 }
 0xe9e   :  { %v340_v35 = vrot.slane %v335_v56, %v2487_v11  ;;  %v344_v18 = vrot.slane %v335_v56, %v2474_v6  ;;  %v2237_v56 = vcvt.s32.f32 %v2967_v36 }
 0xea0   :  { %v3080_v50 = vadd.f32 %v340_v35, %v2983_v52  ;;  %v3083_v39 = vadd.f32 %v344_v18, %v2985_v8  ;;  %v2055_v52 = vshrl.u32 %v2053_v1, 16  ;;  %v2238_v35 = vsel %vm355_vm4, %v2237_v56, 0.0 }
 0xea1   :  { %v3085_v61 = vpop.xlane.xlu1 %1732 }
 0xea2   :  { %v1734_v23 = vsub.f32 %v3018_v31, %v3085_v61  ;;  %v2057_v9 = vcvt.s32.f32 %v2055_v52 }
 0xea4   :  { %v1735_v51 = vmul.f32 1.442695, %v1734_v23 }
 0xea5   :  { %v3091_v0 = vpop.xlane.xlu1 %1200 }
 0xea6   :  { %2368 = vpow2.f32 %v1735_v51  ;;  %vm1202_vm2 = vcmp.eq.f32.partialorder %v1199_v10, %v3091_v0 }
 0xea7   :  { %v1203_v48 = vsel %vm1202_vm2, %v1198_v54, inf  ;;  %vm2043_vm2 = vcmp.eq.s32.totalorder %v2517_v21, 6 }
 0xea8   :  { %1204 = vmin.xlane.f32.xlu1 %v1203_v48 }
 0xea9   :  { %v3094_v8 = vpop.xlane.xlu1 %1215 }
 0xeaa   :  { %vm1217_vm12 = vcmp.eq.f32.partialorder %v3036_v12, %v3094_v8  ;;  %v1222_v56 = vcvt.f32.s32 %v3094_v8 }
 0xeac   :  { %2060 = vadd.xlane.f32.xlu1 %v2057_v9 }
 0xead   :  { %v3096_v2 = vpop.xlane.xlu1 %514 }
 0xeae   :  { %vm516_vm6 = vcmp.eq.f32.partialorder %v513_v59, %v3096_v2  ;;  %v521_v17 = vcvt.f32.s32 %v3096_v2 }
 0xeaf   :  { %v517_v5 = vsel %vm516_vm6, %v512_v14, inf  ;;  %vm2068_vm6 = vcmp.eq.s32.totalorder %v2517_v21, 5 }
 0xeb0   :  { %v2369_v38 = vpop.eup %2368  ;;  %2058 = vadd.xlane.f32.xlu1 %v2056_v27  ;;  %518 = vmin.xlane.f32.xlu0 %v517_v5  ;;  %v522_v36 = vshll.u32 %v521_v17, 16 }
 0xeb1   :  { %2310 = vmatmul.mubr.msk.f32.vlgmr.msra.gmra.mrb[8].mxu0 %vm58_vm5, %v2369_v38  ;;  %v530_v10 = vpop.xlane.xlu1 %529 }
 0xeb2   :  { %vm531_vm7 = vcmp.eq.f32.partialorder %v528_v34, %v530_v10  ;;  %v2235_v34 = vcvt.s32.f32 %v2924_v25  ;;  %v1211_v25 = vand.u32 65535, %v3024_v42  ;;  %v3236_v42 = vmov 3  }
 0xeb3   :  { %v532_v63 = vsel %vm531_vm7, %v527_v26, inf  ;;  %vm2093_vm7 = vcmp.eq.s32.totalorder %v2517_v21, 4 }
 0xeb4   :  { %533 = vmin.xlane.f32.xlu0 %v532_v63  ;;  %v2236_v29 = vsel %vm355_vm4, %v2235_v34, 0.0  ;;  %v1213_v58 = vcvt.s32.f32 %v1211_v25 }
 0xeb5   :  { %v3102_v15 = vpop.xlane.xlu1 %742 }
 0xeb6   :  { %vm744_vm9 = vcmp.eq.f32.partialorder %v741_v32, %v3102_v15  ;;  %v749_v2 = vcvt.f32.s32 %v3102_v15 }
 0xeb7   :  { %v745_v59 = vsel %vm744_vm9, %v740_v44, inf }
 0xeb8   :  { %746 = vmin.xlane.f32.xlu0 %v745_v59  ;;  %v750_v59 = vshll.u32 %v749_v2, 16 }
 0xeb9   :  { %v3106_v45 = vpop.xlane.xlu1 %757 }
 0xeba   :  { %vm759_vm5 = vcmp.eq.f32.partialorder %v756_v60, %v3106_v45  ;;  %v984_v60 = vcvt.s32.f32 %v982_v7  ;;  %v764_v26 = vcvt.f32.s32 %v3106_v45 }
 0xebb   :  { %v760_v13 = vsel %vm759_vm5, %v755_v22, inf  ;;  %vm2118_vm5 = vcmp.eq.s32.totalorder %v2517_v21, 3 }
 0xebc   :  { %761 = vmin.xlane.f32.xlu0 %v760_v13  ;;  %v765_v46 = vshll.u32 %v764_v26, 16 }
 0xebd   :  { %v3111_v57 = vpop.xlane.xlu1 %971 }
 0xebe   :  { %vm973_vm10 = vcmp.eq.f32.partialorder %v3068_v43, %v3111_v57  ;;  %v1218_v43 = vsel %vm1217_vm12, %v1213_v58, inf  ;;  %vm2168_vm12 = vcmp.eq.s32.totalorder %v2517_v21, 1 }
 0xebf   :  { %v974_v32 = vsel %vm973_vm10, %v969_v47, inf  ;;  %v978_v47 = vcvt.f32.s32 %v3111_v57  ;;  %vm2143_vm10 = vcmp.eq.s32.totalorder %v2517_v21, 2 }
 0xec0   :  { %975 = vmin.xlane.f32.xlu0 %v974_v32 }
 0xec1   :  { %2021 = vperm.xlu1 %2337, %v2236_v29   ;;  %v3118_v24 = vpop.xlane.xlu1 %986  ;;  %v979_v58 = vshll.u32 %v978_v47, 16 }
 0xec2   :  { %vm988_vm14 = vcmp.eq.f32.partialorder %v3072_v40, %v3118_v24  ;;  %v993_v32 = vcvt.f32.s32 %v3118_v24 }
 0xec3   :  { %v989_v33 = vsel %vm988_vm14, %v984_v60, inf }
 0xec4   :  { %990 = vmin.xlane.f32.xlu0 %v989_v33  ;;  %v1207_v33 = vcvt.f32.s32 %v3091_v0  ;;  %v994_v57 = vshll.u32 %v993_v32, 16 }
 0xec5   :  { %2339 = vset.pattern.permute.xlu1 %v2412_v55  ;;  %v536_v55 = vcvt.f32.s32 %v530_v10 }
 0xec6   :  { %v1208_v24 = vshll.u32 %v1207_v33, 16 }
 0xec7   :  { %v537_v9 = vshll.u32 %v536_v55, 16 }
 0xec8   :  { %1219 = vmin.xlane.f32.xlu0 %v1218_v43 }
 0xede   :  { %2046 = vperm.xlu0 %2338, %v2238_v35  }
 0xee2   :  { %2341 = vset.pattern.permute.xlu0 %v3236_v42 }
 0xf35   :  { %v1205_v18 = vpop.xlane.xlu1 %1204 }
 0xf36   :  { %v1206_v42 = vcvt.f32.s32 %v1205_v18 }
 0xf39   :  { %v2061_v40 = vpop.xlane.xlu1 %2060 }
 0xf3a   :  { %v2063_v49 = vcvt.f32.s32 %v2061_v40 }
 0xf3c   :  { %v2064_v1 = vshll.u32 %v2063_v49, 16 }
 0xf3d   :  { %v2059_v23 = vpop.xlane.xlu1 %2058  ;;  %v519_v12 = vpop.xlane.xlu0 %518 }
 0xf3e   :  { %v2062_v51 = vcvt.f32.s32 %v2059_v23  ;;  %v520_v54 = vcvt.f32.s32 %v519_v12  ;;  %v1223_v23 = vshll.u32 %v1222_v56, 16 }
 0xf40   :  { %v3131_v52 = vadd.s32 %v2064_v1, %v2062_v51  ;;  %v523_v41 = vadd.s32 %v522_v36, %v520_v54  ;;  %v1209_v1 = vadd.s32 %v1208_v24, %v1206_v42 }
 0xf41   :  { %v534_v48 = vpop.xlane.xlu0 %533 }
 0xf42   :  { %vm2076_vm13 = vcmp.eq.s32.totalorder %v2517_v21, %v3131_v52  ;;  %v535_v14 = vcvt.f32.s32 %v534_v48  ;;  %v542_v63 = vrot.slane %v523_v41, %v2614_v30  ;;  %v1228_v36 = vrot.slane %v1209_v1, %v2614_v30 }
 0xf43   :  { %v2077_v53 = vsel %vm2076_vm13, %v2075_v4, 0  ;;  %v1811_v41 = vrot.slane %v3085_v61, 1 }
 0xf44   :  { %v3137_v27 = vsel %vm77_vm1, %v2077_v53, 0  ;;  %v538_v5 = vadd.s32 %v537_v9, %v535_v14  ;;  %v1812_v14 = vrot.slane %v3085_v61, 2 }
 0xf45   :  { %v747_v38 = vpop.xlane.xlu0 %746  ;;  %v2080_v10 = vshrl.u32 %v3137_v27, 16 }
 0xf46   :  { %v748_v3 = vcvt.f32.s32 %v747_v38  ;;  %v546_v44 = vrot.slane %v538_v5, %v2614_v30  ;;  %v1815_v5 = vadd.f32 %v2939_v19, %v1811_v41  ;;  %v1816_v38 = vadd.f32 %v2897_v37, %v1812_v14 }
 0xf47   :  { %v2082_v28 = vcvt.s32.f32 %v2080_v10  ;;  %v2239_v19 = vcvt.s32.f32 %v3131_v52 }
 0xf48   :  { %v547_v22 = vsel %vm74_vm0, %v546_v44, %v542_v63  ;;  %v751_v13 = vadd.s32 %v750_v59, %v748_v3 }
 0xf49   :  { %2085 = vadd.xlane.f32.xlu0 %v2082_v28  ;;  %v762_v15 = vpop.xlane.xlu0 %761  ;;  %548 = vst.msk [vmem:[#allocation2] sm:$0x3] %vm77_vm1, %v547_v22  ;;  %v2240_v37 = vsel %vm355_vm4, %v2239_v19, 0.0 }
 0xf4a   :  { %v763_v34 = vcvt.f32.s32 %v762_v15  ;;  %v770_v29 = vrot.slane %v751_v13, %v2614_v30  ;;  %v3237_v15 = vmov 4  }
 0xf4c   :  { %v766_v7 = vadd.s32 %v765_v46, %v763_v34  ;;  %v2079_v46 = vand.u32 65535, %v3137_v27  ;;  %v2022_v34 = vpop.permute.xlu1 %2021 }
 0xf4d   :  { %v976_v45 = vpop.xlane.xlu0 %975 }
 0xf4e   :  { %v774_v60 = vrot.slane %v766_v7, %v2614_v30  ;;  %v977_v25 = vcvt.f32.s32 %v976_v45  ;;  %v2081_v13 = vcvt.s32.f32 %v2079_v46 }
 0xf50   :  { %v775_v43 = vsel %vm74_vm0, %v774_v60, %v770_v29  ;;  %v980_v40 = vadd.s32 %v979_v58, %v977_v25 }
 0xf51   :  { %777 = vst.msk [vmem:[#allocation2 + $0x2] sm:$0x3] %vm77_vm1, %v775_v43  ;;  %v991_v35 = vpop.xlane.xlu0 %990 }
 0xf52   :  { %v992_v49 = vcvt.f32.s32 %v991_v35  ;;  %v999_v51 = vrot.slane %v980_v40, %v2614_v30 }
 0xf54   :  { %v995_v17 = vadd.s32 %v994_v57, %v992_v49  ;;  %v3238_v49 = vmov 2  }
 0xf55   :  { %v1220_v12 = vpop.xlane.xlu0 %1219 }
 0xf56   :  { %v1003_v0 = vrot.slane %v995_v17, %v2614_v30  ;;  %v1221_v55 = vcvt.f32.s32 %v1220_v12 }
 0xf58   :  { %v1004_v54 = vsel %vm74_vm0, %v1003_v0, %v999_v51  ;;  %v1224_v8 = vadd.s32 %v1223_v23, %v1221_v55 }
 0xf59   :  { %1006 = vst.msk [vmem:[#allocation2 + $0x4] sm:$0x3] %vm77_vm1, %v1004_v54 }
 0xf5a   :  { %v1232_v18 = vrot.slane %v1224_v8, %v2614_v30 }
 0xf5c   :  { %v1233_v48 = vsel %vm74_vm0, %v1232_v18, %v1228_v36 }
 0xf5d   :  { %1235 = vst.msk [vmem:[#allocation2 + $0x6] sm:$0x3] %vm77_vm1, %v1233_v48  ;;  %v2047_v52 = vpop.permute.xlu0 %2046 }
 0xf64   :  { %v2100_v43 = vld [vmem:[#allocation2 + $0x6] sm:$0x3] }
 0xf84   :  { %v1806_v4 = vpop.f32.mrb[8].mxu0 }
 0xf85   :  { %2370 = vlog2.f32 %v1806_v4  ;;  %v2311_v9 = vpop.f32.mrb[9].mxu0 }
 0xf8f   :  { %v2371_v53 = vpop.eup %2370 }
 0xf90   :  { %v1818_v2 = vmul.f32 0.6931472, %v2371_v53 }
 0xf92   :  { %v1820_v10 = vrot.slane %v1818_v2, 1  ;;  %v1821_v26 = vrot.slane %v1818_v2, 2 }
 0xf94   :  { %v1824_v30 = vadd.f32 %v1820_v10, %v1815_v5  ;;  %v1825_v3 = vadd.f32 %v1821_v26, %v1816_v38  ;;  %v2125_v10 = vld [vmem:[#allocation2 + $0x4] sm:$0x3] }
 0xf96   :  { %v1832_v63 = vrot.slane %v1824_v30, 7  ;;  %v1833_v44 = vrot.slane %v1825_v3, 6 }
 0xf98   :  { %v1834_v28 = vsel %vm74_vm0, %v1833_v44, %v1832_v63 }
 0xf99   :  { %v1836_v59 = vsel %vm1829_vm3, %v1834_v28, %v3018_v31 }
 0xf9a   :  { %v1960_v61 = vadd.f32 %v1836_v59, %v2871_v62 }
 0xf9c   :  { %v1961_v22 = vsel %vm77_vm1, %v1960_v61, -inf }
 0xf9d   :  { %1962 = vmax.xlane.f32.xlu1 %v1961_v22 }
 0xfae   :  { %2071 = vperm.xlu1 %2339, %v2240_v37  }
 0xfb2   :  { %2340 = vset.pattern.permute.xlu1 %v3237_v15 }
 0xfd2   :  { %2083 = vadd.xlane.f32.xlu1 %v2081_v13 }
 0xfd6   :  { %v2086_v45 = vpop.xlane.xlu0 %2085 }
 0xfd7   :  { %v2088_v29 = vcvt.f32.s32 %v2086_v45 }
 0xfd9   :  { %v2089_v25 = vshll.u32 %v2088_v29, 16 }
0x102a   :  { %v1963_v20 = vpop.xlane.xlu1 %1962 }
0x102b   :  { %v1964_v31 = vsub.f32 %v1960_v61, %v1963_v20  ;;  %v3239_v61 = vmov 1  }
0x102d   :  { %v1965_v47 = vmul.f32 1.442695, %v1964_v31 }
0x102e   :  { %v2072_v32 = vpop.permute.xlu1 %2071 }
0x102f   :  { %2372 = vpow2.f32 %v1965_v47 }
0x1039   :  { %v2373_v62 = vpop.eup %2372 }
0x103a   :  { %v1967_v7 = vsel %vm77_vm1, %v2373_v62, 0.0 }
0x103b   :  { %1968 = vadd.xlane.f32.xlu0 %v1967_v7 }
0x105f   :  { %v2084_v60 = vpop.xlane.xlu1 %2083 }
0x1060   :  { %v2087_v33 = vcvt.f32.s32 %v2084_v60 }
0x1062   :  { %v2090_v58 = vadd.s32 %v2089_v25, %v2087_v33 }
0x1064   :  { %v2241_v27 = vcvt.s32.f32 %v2090_v58  ;;  %vm2101_vm3 = vcmp.eq.s32.totalorder %v2517_v21, %v2090_v58 }
0x1065   :  { %v2102_v56 = vsel %vm2101_vm3, %v2100_v43, 0 }
0x1066   :  { %v2242_v35 = vsel %vm355_vm4, %v2241_v27, 0.0  ;;  %v2103_v57 = vsel %vm77_vm1, %v2102_v56, 0 }
0x1067   :  { %2096 = vperm.xlu1 %2340, %v2242_v35   ;;  %v2105_v42 = vshrl.u32 %v2103_v57, 16  ;;  %v2104_v24 = vand.u32 65535, %v2103_v57 }
0x1069   :  { %v2107_v40 = vcvt.s32.f32 %v2105_v42  ;;  %v2106_v17 = vcvt.s32.f32 %v2104_v24 }
0x106b   :  { %2110 = vadd.xlane.f32.xlu0 %v2107_v40  ;;  %2342 = vset.pattern.permute.xlu1 %v3238_v49  ;;  %v2175_v40 = vld [vmem:[#allocation2] sm:$0x3] }
0x108b   :  { %2108 = vadd.xlane.f32.xlu1 %v2106_v17 }
0x10c8   :  { %v1969_v23 = vpop.xlane.xlu0 %1968 }
0x10c9   :  { %2374 = vlog2.f32 %v1969_v23 }
0x10d3   :  { %v2375_v12 = vpop.eup %2374 }
0x10d4   :  { %v1971_v1 = vmul.f32 0.6931472, %v2375_v12 }
0x10d6   :  { %v1972_v51 = vadd.f32 %v1971_v1, %v1963_v20  ;;  %v2150_v20 = vld [vmem:[#allocation2 + $0x2] sm:$0x3] }
0x10d8   :  { %v1977_v0 = vrot.slane %v1972_v51, %v2487_v11  ;;  %v1981_v55 = vrot.slane %v1972_v51, %v2474_v6  ;;  %v2024_v6 = vsel %vm2018_vm8, %v2022_v34, 0.0 }
0x10d9   :  { %v2049_v11 = vsel %vm2043_vm2, %v2047_v52, %v2024_v6 }
0x10da   :  { %v1984_v54 = vsub.f32 %v3080_v50, %v1977_v0  ;;  %v1985_v8 = vsub.f32 %v3083_v39, %v1981_v55  ;;  %v2074_v50 = vsel %vm2068_vm6, %v2072_v32, %v2049_v11 }
0x10dc   :  { %v1987_v36 = vsub.f32 0.0, %v1985_v8  ;;  %v1986_v18 = vsub.f32 0.0, %v1984_v54 }
0x10de   :  { %v1990_v48 = vrot.slane %v1987_v36, 7 }
0x10e0   :  { %v1991_v4 = vsel %vm74_vm0, %v1990_v48, %v1986_v18 }
0x10e1   :  { %1994 = vst.msk [vmem:[%s3230_s6] sm:$0x3] %vm1993_vm15, %v1991_v4  ;;  %s2416_s6 = smov [#allocation3]  }
0x10e2   :  { %s2203_s20 = sshll.u32 %s2416_s6, 4  ;;  %s2204_s20 = int_to_ptr.vmem [resolvable:$true] %s2203_s20 }
0x10e3   :  { %s2380_s21 = scalar_lea.vmem %s2204_s20, 32  ;;  %p2385_p1 = scmp.lt.s32.totalorder %s2204_s20, %s2204_s20 }
0x10e4   :  { %p2381_p0 = scmp.ne.s32.totalorder %s2204_s20, %s2380_s21  ;;  %p2386_p2 = scmp.lt.s32.totalorder %s2380_s21, %s2380_s21 }
0x10e6   :  { %v2097_v39 = vpop.permute.xlu1 %2096  ;;  %p2387_p3 = por %p2386_p2, %p2385_p1 }
0x10e7   :  { %v2099_v9 = vsel %vm2093_vm7, %v2097_v39, %v2074_v50 }
0x10e8   :  { %p2388_p4 = pnand %p2387_p3, %p2381_p0 }
0x10f8   :  { %v2111_v41 = vpop.xlane.xlu0 %2110 }
0x10f9   :  { %v2113_v14 = vcvt.f32.s32 %v2111_v41 }
0x10fb   :  { %v2114_v2 = vshll.u32 %v2113_v14, 16 }
0x1118   :  { %v2109_v53 = vpop.xlane.xlu1 %2108 }
0x1119   :  { %v2112_v5 = vcvt.f32.s32 %v2109_v53 }
0x111b   :  { %v2115_v38 = vadd.s32 %v2114_v2, %v2112_v5 }
0x111d   :  { %vm2126_vm0 = vcmp.eq.s32.totalorder %v2517_v21, %v2115_v38  ;;  %v2243_v26 = vcvt.s32.f32 %v2115_v38 }
0x111e   :  { %v2127_v30 = vsel %vm2126_vm0, %v2125_v10, 0 }
0x111f   :  { %v2244_v3 = vsel %vm355_vm4, %v2243_v26, 0.0  ;;  %v2128_v63 = vsel %vm77_vm1, %v2127_v30, 0 }
0x1120   :  { %2121 = vperm.xlu0 %2341, %v2244_v3   ;;  %v2129_v44 = vand.u32 65535, %v2128_v63  ;;  %v2130_v59 = vshrl.u32 %v2128_v63, 16 }
0x1122   :  { %v2131_v28 = vcvt.s32.f32 %v2129_v44  ;;  %v2132_v22 = vcvt.s32.f32 %v2130_v59 }
0x1124   :  { %2133 = vadd.xlane.f32.xlu1 %v2131_v28  ;;  %2343 = vset.pattern.permute.xlu0 %v3239_v61 }
0x1128   :  { %2135 = vadd.xlane.f32.xlu1 %v2132_v22 }
0x119f   :  { %v2122_v60 = vpop.permute.xlu0 %2121 }
0x11a0   :  { %v2124_v25 = vsel %vm2118_vm5, %v2122_v60, %v2099_v9 }
0x11b1   :  { %v2134_v19 = vpop.xlane.xlu1 %2133 }
0x11b2   :  { %v2137_v46 = vcvt.f32.s32 %v2134_v19 }
0x11b5   :  { %v2136_v37 = vpop.xlane.xlu1 %2135 }
0x11b6   :  { %v2138_v15 = vcvt.f32.s32 %v2136_v37 }
0x11b8   :  { %v2139_v13 = vshll.u32 %v2138_v15, 16 }
0x11ba   :  { %v2140_v34 = vadd.s32 %v2139_v13, %v2137_v46 }
0x11bc   :  { %v2245_v31 = vcvt.s32.f32 %v2140_v34  ;;  %vm2151_vm9 = vcmp.eq.s32.totalorder %v2517_v21, %v2140_v34 }
0x11bd   :  { %v2152_v47 = vsel %vm2151_vm9, %v2150_v20, 0 }
0x11be   :  { %v2246_v62 = vsel %vm355_vm4, %v2245_v31, 0.0  ;;  %v2153_v7 = vsel %vm77_vm1, %v2152_v47, 0 }
0x11bf   :  { %2146 = vperm.xlu1 %2342, %v2246_v62   ;;  %v2154_v52 = vand.u32 65535, %v2153_v7  ;;  %v2155_v32 = vshrl.u32 %v2153_v7, 16 }
0x11c1   :  { %v2156_v45 = vcvt.s32.f32 %v2154_v52  ;;  %v2157_v29 = vcvt.s32.f32 %v2155_v32 }
0x11c3   :  { %2158 = vadd.xlane.f32.xlu0 %v2156_v45 }
0x11e3   :  { %2160 = vadd.xlane.f32.xlu1 %v2157_v29 }
0x123e   :  { %v2147_v33 = vpop.permute.xlu1 %2146 }
0x123f   :  { %v2149_v58 = vsel %vm2143_vm10, %v2147_v33, %v2124_v25 }
0x1250   :  { %v2159_v27 = vpop.xlane.xlu0 %2158 }
0x1251   :  { %v2162_v35 = vcvt.f32.s32 %v2159_v27 }
0x1270   :  { %v2161_v43 = vpop.xlane.xlu1 %2160 }
0x1271   :  { %v2163_v56 = vcvt.f32.s32 %v2161_v43 }
0x1273   :  { %v2164_v57 = vshll.u32 %v2163_v56, 16 }
0x1275   :  { %v2165_v42 = vadd.s32 %v2164_v57, %v2162_v35 }
0x1277   :  { %v2247_v49 = vcvt.s32.f32 %v2165_v42  ;;  %vm2176_vm14 = vcmp.eq.s32.totalorder %v2517_v21, %v2165_v42 }
0x1278   :  { %v2177_v24 = vsel %vm2176_vm14, %v2175_v40, 0 }
0x1279   :  { %v2248_v17 = vsel %vm355_vm4, %v2247_v49, 0.0  ;;  %v2178_v23 = vsel %vm77_vm1, %v2177_v24, 0  ;;  %vm2191_vm1 = vcmp.eq.s32.totalorder %v2517_v21, 0 }
0x127a   :  { %2171 = vperm.xlu0 %2343, %v2248_v17   ;;  %v2179_v12 = vand.u32 65535, %v2178_v23  ;;  %v2180_v51 = vshrl.u32 %v2178_v23, 16 }
0x127c   :  { %v2181_v1 = vcvt.s32.f32 %v2179_v12  ;;  %v2182_v0 = vcvt.s32.f32 %v2180_v51 }
0x127e   :  { %2183 = vadd.xlane.f32.xlu1 %v2181_v1 }
0x1282   :  { %2185 = vadd.xlane.f32.xlu1 %v2182_v0 }
0x12f9   :  { %v2172_v48 = vpop.permute.xlu0 %2171 }
0x12fa   :  { %v2174_v6 = vsel %vm2168_vm12, %v2172_v48, %v2149_v58 }
0x130b   :  { %v2184_v55 = vpop.xlane.xlu1 %2183 }
0x130c   :  { %v2187_v36 = vcvt.f32.s32 %v2184_v55 }
0x130f   :  { %v2186_v54 = vpop.xlane.xlu1 %2185 }
0x1310   :  { %v2188_v8 = vcvt.f32.s32 %v2186_v54 }
0x1312   :  { %v2189_v18 = vshll.u32 %v2188_v8, 16 }
0x1314   :  { %v2190_v4 = vadd.s32 %v2189_v18, %v2187_v36 }
0x1316   :  { %v2192_v16 = vcvt.s32.f32 %v2190_v4 }
0x1318   :  { %v2193_v11 = vsel %vm2191_vm1, %v2192_v16, %v2174_v6 }
0x1319   :  { %2194 = vst.msk [vmem:[#allocation3] sm:$0x3] %vm295_vm11, %v2193_v11 }
0x131a   :  { %2391 = shalt.err (!%p2388_p4)
}
0x131b   :  { %s2392_s24 = scalar_lea.hbm %s3231_s7, 32 }
0x131c   :  { %p2393_p5 = scmp.ne.s32.totalorder %s3231_s7, %s2392_s24  ;;  %p2396_p6 = scmp.lt.u32.totalorder %s2392_s24, %s3231_s7 }
0x131e   :  { %p2398_p7 = pnand %p2396_p6, %p2393_p5 }
0x1320   :  { %2401 = shalt.err (!%p2398_p7)
}
0x1321   :  { %2206 = dma.vmem_to_hbm [thread:$0]  %s2204_s20, 32, %s3231_s7, [#allocation4]  }
0x1322   :  { %2402 = dma.done.wait [#allocation4], 32  }
0x1323   :  { %2403 = vsyncadd [#allocation4], 4294967264 }
0x1324   :  { %2212 = vsyncpa [#allocation4], 1 }

</bundles_post_ra>
